<compile_context>
chip_gen: v7x
topology: tpu7x:2x2x1
jax: 0.10.0
libtpu: 0.0.40
codegen_flags: <defaults>
</compile_context>

<pallas_src>
import numpy as np
import jax
import jax.numpy as jnp
from jax.experimental import pallas as pl
from jax.experimental.pallas import tpu as pltpu


# ---------------------------------------------------------------------------
# Static index maps (numpy, built once) used to pack the PyTorch weights into
# banded matmul weights.  Pure layout plumbing - no arithmetic on the weights.
# ---------------------------------------------------------------------------
def _build_maps():
    # conv1 banded weight W1p[kh, w*3+c, half*128 + j*6 + n] = w1[n, c, kh, w-(2j+half)]
    i1 = np.zeros((5, 96, 256), np.int32)
    m1 = np.zeros((5, 96, 256), np.bool_)
    for kh in range(5):
        for half in range(2):
            for j in range(14):
                ox = 2 * j + half
                for kw in range(5):
                    w = ox + kw
                    for c in range(3):
                        for n in range(6):
                            i1[kh, w * 3 + c, half * 128 + j * 6 + n] = (
                                (n * 3 + c) * 5 + kh) * 5 + kw
                            m1[kh, w * 3 + c, half * 128 + j * 6 + n] = True

    # conv2 banded weight W2p[kh, j*6+c, half*128 + j2*16 + n] = w2[n, c, kh, j-(2j2+half)]
    i2 = np.zeros((5, 128, 256), np.int32)
    m2 = np.zeros((5, 128, 256), np.bool_)
    for kh in range(5):
        for half in range(2):
            for j2 in range(5):
                ox2 = 2 * j2 + half
                for kw in range(5):
                    j = ox2 + kw
                    for c in range(6):
                        for n in range(16):
                            i2[kh, j * 6 + c, half * 128 + j2 * 16 + n] = (
                                (n * 6 + c) * 5 + kh) * 5 + kw
                            m2[kh, j * 6 + c, half * 128 + j2 * 16 + n] = True

    # fc1 weight, one (128,128) slab per pooled row i2; torch flatten is (c,h,w):
    # Wfcp[i2, j2*16+n, o] = wfc[o, n*25 + i2*5 + j2]
    if_ = np.zeros((5, 128, 128), np.int32)
    mf_ = np.zeros((5, 128, 128), np.bool_)
    for i2_ in range(5):
        for j2 in range(5):
            for n in range(16):
                f = n * 25 + i2_ * 5 + j2
                for o in range(120):
                    if_[i2_, j2 * 16 + n, o] = o * 400 + f
                    mf_[i2_, j2 * 16 + n, o] = True

    ib1 = np.zeros((128,), np.int32); mb1 = np.zeros((128,), np.bool_)
    for j in range(14):
        for n in range(6):
            ib1[j * 6 + n] = n; mb1[j * 6 + n] = True
    ib2 = np.zeros((128,), np.int32); mb2 = np.zeros((128,), np.bool_)
    for j2 in range(5):
        for n in range(16):
            ib2[j2 * 16 + n] = n; mb2[j2 * 16 + n] = True
    ibf = np.zeros((128,), np.int32); mbf = np.zeros((128,), np.bool_)
    ibf[:120] = np.arange(120); mbf[:120] = True
    return (i1, m1), (i2, m2), (if_, mf_), (ib1, mb1), (ib2, mb2), (ibf, mbf)


(_I1, _M1), (_I2, _M2), (_IF, _MF), (_IB1, _MB1), (_IB2, _MB2), (_IBF, _MBF) = _build_maps()


def _pack_params(w1, b1, w2, b2, wfc, bfc):
    # Packing only copies values into the banded layouts (indices above are
    # static numpy), so the bf16 cast of w1p is lossless for bf16-rounded data.
    w1p = jnp.where(_M1, w1.reshape(-1)[_I1], 0.0).astype(jnp.bfloat16)   # (5,96,256)
    w2p = jnp.where(_M2, w2.reshape(-1)[_I2], 0.0).astype(jnp.float32)    # (5,128,256)
    wfp = jnp.where(_MF, wfc.reshape(-1)[_IF], 0.0).astype(jnp.float32)   # (5,128,128)
    b1t = jnp.where(_MB1, b1[_IB1], 0.0).reshape(1, 128).astype(jnp.float32)
    b2t = jnp.where(_MB2, b2[_IB2], 0.0).reshape(1, 128).astype(jnp.float32)
    bft = jnp.where(_MBF, bfc[_IBF], 0.0).reshape(1, 128).astype(jnp.float32)
    return w1p, b1t, w2p, b2t, wfp, bft


# ---------------------------------------------------------------------------
# Fused kernel
# ---------------------------------------------------------------------------
def _fused_kernel(x_ref, w1_ref, b1_ref, w2_ref, b2_ref, wfc_ref, bfc_ref,
                  out_ref, c1_ref, h1_ref, c2_ref):
    B = x_ref.shape[0]

    # ---- stage 1: conv1 as 5 banded matmuls, K=96, N=256 (bf16 -> f32 acc) --
    # W1 column = half*128 + j*6 + n  ->  conv output at ox = 2*j+half, chan n,
    # so the 2x2-pool over x is a max of the two aligned 128-lane halves.
    acc = None
    for kh in range(5):
        lhs = x_ref[:, kh:kh + 32, :].reshape(B * 32, 96)   # rows = (b, oy)
        p = jnp.dot(lhs, w1_ref[kh], preferred_element_type=jnp.float32)
        acc = p if acc is None else acc + p                 # (B*32, 256)
    c1_ref[...] = jnp.maximum(acc[:, :128], acc[:, 128:])   # pool over ox parity

    # pool over oy (stride-2 row pairs) + bias + ReLU.
    # (bias-after-max == max-after-bias: per-channel bias, monotone ReLU.)
    m = jnp.maximum(c1_ref[pl.ds(0, B * 16, 2), :],
                    c1_ref[pl.ds(1, B * 16, 2), :])         # (B*16, 128)
    h1_ref[:, :16, :] = jnp.maximum(m + b1_ref[...], 0.0).reshape(B, 16, 128)
    h1_ref[:, 16:, :] = jnp.zeros((B, 8, 128), jnp.float32)  # pad rows for kh slices
    # h1 lane = j*6 + n over the pooled 14x14 grid; rows 14.. only feed
    # discarded conv2 rows (oy2 >= 10), so they never touch valid outputs.

    # ---- stage 2: conv2 as 5 banded matmuls, K=128, N=256 (f32) -------------
    acc2 = None
    for kh in range(5):
        lhs = h1_ref[:, kh:kh + 16, :].reshape(B * 16, 128)
        p = jnp.dot(lhs, w2_ref[kh], preferred_element_type=jnp.float32)
        acc2 = p if acc2 is None else acc2 + p               # (B*16, 256)
    c2_ref[...] = jnp.maximum(acc2[:, :128], acc2[:, 128:]).reshape(B, 16, 128)

    # ---- pool(2,2) + bias + ReLU + fc1 + ReLU; flatten folded into wfc ------
    fc = None
    for i2 in range(5):
        m2 = jnp.maximum(c2_ref[:, 2 * i2, :], c2_ref[:, 2 * i2 + 1, :])  # (B,128)
        h2 = jnp.maximum(m2 + b2_ref[...], 0.0)
        p = jnp.dot(h2, wfc_ref[i2], preferred_element_type=jnp.float32)
        fc = p if fc is None else fc + p                     # (B, 128)
    out_ref[...] = jnp.maximum(fc + bfc_ref[...], 0.0)


# ---------------------------------------------------------------------------
# Host wrapper (layout plumbing only)
# ---------------------------------------------------------------------------
@jax.jit
def forward(x_nchw, params):
    w1, b1, w2, b2, wfc, bfc = params
    assert x_nchw.shape[1:] == (3, 32, 32), x_nchw.shape
    b = x_nchw.shape[0]

    w1p, b1t, w2p, b2t, wfp, bft = _pack_params(
        w1.astype(jnp.float32), b1.astype(jnp.float32),
        w2.astype(jnp.float32), b2.astype(jnp.float32),
        wfc.astype(jnp.float32), bfc.astype(jnp.float32))

    # image -> (B, 36, 96) bf16; lane = w*3 + c; 4 zero pad rows so every
    # kh-slice inside the kernel is a full 32-row (8-aligned) window.
    x = jnp.transpose(x_nchw.astype(jnp.float32), (0, 2, 3, 1)).reshape(b, 32, 96)
    x = jnp.pad(x, ((0, 0), (0, 4), (0, 0))).astype(jnp.bfloat16)

    # Batch block: 32 fits comfortably in every generation's scoped VMEM
    # (v5e 16 MiB default, v7x 64 MiB physical) and gives grid >= 2 for
    # multi-block batches (v7x dual TensorCore).
    bblk = b if b <= 32 else 32
    bp = ((b + bblk - 1) // bblk) * bblk
    if bp != b:
        x = jnp.pad(x, ((0, bp - b), (0, 0), (0, 0)))

    out = pl.pallas_call(
        _fused_kernel,
        out_shape=jax.ShapeDtypeStruct((bp, 128), jnp.float32),
        grid=(bp // bblk,),
        in_specs=[
            pl.BlockSpec((bblk, 36, 96), lambda i: (i, 0, 0)),   # image
            pl.BlockSpec((5, 96, 256), lambda i: (0, 0, 0)),     # conv1 banded w
            pl.BlockSpec((1, 128), lambda i: (0, 0)),            # b1 tile
            pl.BlockSpec((5, 128, 256), lambda i: (0, 0, 0)),    # conv2 banded w
            pl.BlockSpec((1, 128), lambda i: (0, 0)),            # b2 tile
            pl.BlockSpec((5, 128, 128), lambda i: (0, 0, 0)),    # fc1 w (per row)
            pl.BlockSpec((1, 128), lambda i: (0, 0)),            # fc1 b tile
        ],
        out_specs=pl.BlockSpec((bblk, 128), lambda i: (i, 0)),
        scratch_shapes=[
            pltpu.VMEM((bblk * 32, 128), jnp.float32),   # conv1 (ox-pooled) rows
            pltpu.VMEM((bblk, 24, 128), jnp.float32),    # h1 (+6..8 pad rows)
            pltpu.VMEM((bblk, 16, 128), jnp.float32),    # conv2 (ox-pooled) rows
        ],
        compiler_params=pltpu.CompilerParams(
            dimension_semantics=("parallel",),
            vmem_limit_bytes=32 * 1024 * 1024),
    )(x, w1p, b1t, w2p, b2t, wfp, bft)
    return out[:b, :120]


# ---------------------------------------------------------------------------
# Pure-JAX reference for verification
# ---------------------------------------------------------------------------
def reference_forward(x_nchw, params):
    w1, b1, w2, b2, wfc, bfc = params

    def conv(x, w, bias):
        y = jax.lax.conv_general_dilated(
            x, w, window_strides=(1, 1), padding='VALID',
            dimension_numbers=('NCHW', 'OIHW', 'NCHW'))
        return y + bias[None, :, None, None]

    def pool(x):
        return jax.lax.reduce_window(x, -jnp.inf, jax.lax.max,
                                     (1, 1, 2, 2), (1, 1, 2, 2), 'VALID')

    h = pool(jax.nn.relu(conv(x_nchw, w1, b1)))
    h = pool(jax.nn.relu(conv(h, w2, b2)))
    h = h.reshape(h.shape[0], -1)
    return jax.nn.relu(jnp.dot(h, wfc.T) + bfc[None, :])


if __name__ == "__main__":
    key = jax.random.PRNGKey(0)
    kx, k1, k2, k3, k4, k5, k6 = jax.random.split(key, 7)
    batch = 2

    # bf16-representable test data so the kernel's bf16 stage-1 operands are
    # lossless and kernel vs. reference differ only by accumulation order.
    def rnd(a):
        return a.astype(jnp.bfloat16).astype(jnp.float32)

    # CIFAR-sized input is required by fc1 (16*5*5 = 400 features).
    x = rnd(jax.random.normal(kx, (batch, 3, 32, 32), jnp.float32))
    w1 = rnd(jax.random.normal(k1, (6, 3, 5, 5), jnp.float32) * 0.1)
    b1 = rnd(jax.random.normal(k2, (6,), jnp.float32) * 0.1)
    w2 = rnd(jax.random.normal(k3, (16, 6, 5, 5), jnp.float32) * 0.1)
    b2 = rnd(jax.random.normal(k4, (16,), jnp.float32) * 0.1)
    wfc = rnd(jax.random.normal(k5, (120, 400), jnp.float32) * 0.05)
    bfc = rnd(jax.random.normal(k6, (120,), jnp.float32) * 0.05)
    params = (w1, b1, w2, b2, wfc, bfc)

    out = jax.block_until_ready(forward(x, params))
    assert out.shape == (batch, 120), out.shape

    ref = jax.block_until_ready(reference_forward(x, params))
    err = float(np.max(np.abs(np.asarray(out) - np.asarray(ref))))
    if not np.allclose(np.asarray(out), np.asarray(ref), rtol=2e-2, atol=2e-2):
        raise AssertionError(f"mismatch vs reference, max abs err = {err}")
    print("KERNEL_OK")
</pallas_src>

<mosaic_0001>
module attributes {stable_mosaic.version = 11 : i64} {
  func.func private @main(%arg0: i32) attributes {dimension_semantics = [#tpu.dimension_semantics<core_parallel>], iteration_bounds = array<i64: 2>, tpu.core_type = #tpu.core_type<sc_scalar_subcore>, window_params = []} {
    return
  }
}

module attributes {stable_mosaic.version = 11 : i64} {
  func.func private @main(%arg0: i32) attributes {dimension_semantics = [#tpu.dimension_semantics<core_parallel>], iteration_bounds = array<i64: 2>, tpu.core_type = #tpu.core_type<sc_scalar_subcore>, window_params = []} {
    return
  }
}

module attributes {stable_mosaic.version = 11 : i64} {
  func.func @_fused_kernel(%arg0: i32, %arg1: memref<2x36x96xbf16, #tpu.memory_space<vmem>>, %arg2: memref<5x96x256xbf16, #tpu.memory_space<vmem>>, %arg3: memref<1x128xf32, #tpu.memory_space<vmem>>, %arg4: memref<5x128x256xf32, #tpu.memory_space<vmem>>, %arg5: memref<1x128xf32, #tpu.memory_space<vmem>>, %arg6: memref<5x128x128xf32, #tpu.memory_space<vmem>>, %arg7: memref<1x128xf32, #tpu.memory_space<vmem>>, %arg8: memref<2x128xf32, #tpu.memory_space<vmem>>, %arg9: memref<64x128xf32, #tpu.memory_space<vmem>>, %arg10: memref<2x24x128xf32, #tpu.memory_space<vmem>>, %arg11: memref<2x16x128xf32, #tpu.memory_space<vmem>>) attributes {dimension_semantics = [#tpu.dimension_semantics<parallel>], iteration_bounds = array<i64: 1>, scalar_prefetch = 0 : i64, scratch_operands = 3 : i64, tpu.core_type = #tpu.core_type<tc>, window_params = [{transform_indices = @transform_0, window_bounds = array<i64: 2, 36, 96>}, {pipeline_mode = #tpu.pipeline_mode<synchronous>, transform_indices = @transform_1, window_bounds = array<i64: 5, 96, 256>}, {pipeline_mode = #tpu.pipeline_mode<synchronous>, transform_indices = @transform_2, window_bounds = array<i64: 1, 128>}, {pipeline_mode = #tpu.pipeline_mode<synchronous>, transform_indices = @transform_3, window_bounds = array<i64: 5, 128, 256>}, {pipeline_mode = #tpu.pipeline_mode<synchronous>, transform_indices = @transform_4, window_bounds = array<i64: 1, 128>}, {pipeline_mode = #tpu.pipeline_mode<synchronous>, transform_indices = @transform_5, window_bounds = array<i64: 5, 128, 128>}, {pipeline_mode = #tpu.pipeline_mode<synchronous>, transform_indices = @transform_6, window_bounds = array<i64: 1, 128>}, {transform_indices = @transform_7, window_bounds = array<i64: 2, 128>}]} {
    %c0 = arith.constant 0 : index
    %c0_0 = arith.constant 0 : index
    %c0_1 = arith.constant 0 : index
    %0 = vector.load %arg1[%c0, %c0_0, %c0_1] : memref<2x36x96xbf16, #tpu.memory_space<vmem>>, vector<2x32x96xbf16>
    %1 = vector.shape_cast %0 : vector<2x32x96xbf16> to vector<64x96xbf16>
    %c0_2 = arith.constant 0 : index
    %c0_3 = arith.constant 0 : index
    %c0_4 = arith.constant 0 : index
    %2 = vector.load %arg2[%c0_2, %c0_3, %c0_4] : memref<5x96x256xbf16, #tpu.memory_space<vmem>>, vector<1x96x256xbf16>
    %3 = vector.shape_cast %2 : vector<1x96x256xbf16> to vector<96x256xbf16>
    %cst = arith.constant dense<0.000000e+00> : vector<64x256xf32>
    %4 = tpu.matmul %1, %3, %cst {dimension_numbers = #tpu.dot_dimension_numbers<[1], [0], [0], [1], [0, 0, 1, 1], [], []>} : vector<64x96xbf16>, vector<96x256xbf16>, vector<64x256xf32> -> vector<64x256xf32>
    %c0_5 = arith.constant 0 : index
    %c1 = arith.constant 1 : index
    %c0_6 = arith.constant 0 : index
    %5 = vector.load %arg1[%c0_5, %c1, %c0_6] : memref<2x36x96xbf16, #tpu.memory_space<vmem>>, vector<2x32x96xbf16>
    %6 = vector.shape_cast %5 : vector<2x32x96xbf16> to vector<64x96xbf16>
    %c1_7 = arith.constant 1 : index
    %c0_8 = arith.constant 0 : index
    %c0_9 = arith.constant 0 : index
    %7 = vector.load %arg2[%c1_7, %c0_8, %c0_9] : memref<5x96x256xbf16, #tpu.memory_space<vmem>>, vector<1x96x256xbf16>
    %8 = vector.shape_cast %7 : vector<1x96x256xbf16> to vector<96x256xbf16>
    %cst_10 = arith.constant dense<0.000000e+00> : vector<64x256xf32>
    %9 = tpu.matmul %6, %8, %cst_10 {dimension_numbers = #tpu.dot_dimension_numbers<[1], [0], [0], [1], [0, 0, 1, 1], [], []>} : vector<64x96xbf16>, vector<96x256xbf16>, vector<64x256xf32> -> vector<64x256xf32>
    %10 = arith.addf %4, %9 : vector<64x256xf32>
    %c0_11 = arith.constant 0 : index
    %c2 = arith.constant 2 : index
    %c0_12 = arith.constant 0 : index
    %11 = vector.load %arg1[%c0_11, %c2, %c0_12] : memref<2x36x96xbf16, #tpu.memory_space<vmem>>, vector<2x32x96xbf16>
    %12 = vector.shape_cast %11 : vector<2x32x96xbf16> to vector<64x96xbf16>
    %c2_13 = arith.constant 2 : index
    %c0_14 = arith.constant 0 : index
    %c0_15 = arith.constant 0 : index
    %13 = vector.load %arg2[%c2_13, %c0_14, %c0_15] : memref<5x96x256xbf16, #tpu.memory_space<vmem>>, vector<1x96x256xbf16>
    %14 = vector.shape_cast %13 : vector<1x96x256xbf16> to vector<96x256xbf16>
    %cst_16 = arith.constant dense<0.000000e+00> : vector<64x256xf32>
    %15 = tpu.matmul %12, %14, %cst_16 {dimension_numbers = #tpu.dot_dimension_numbers<[1], [0], [0], [1], [0, 0, 1, 1], [], []>} : vector<64x96xbf16>, vector<96x256xbf16>, vector<64x256xf32> -> vector<64x256xf32>
    %16 = arith.addf %10, %15 : vector<64x256xf32>
    %c0_17 = arith.constant 0 : index
    %c3 = arith.constant 3 : index
    %c0_18 = arith.constant 0 : index
    %17 = vector.load %arg1[%c0_17, %c3, %c0_18] : memref<2x36x96xbf16, #tpu.memory_space<vmem>>, vector<2x32x96xbf16>
    %18 = vector.shape_cast %17 : vector<2x32x96xbf16> to vector<64x96xbf16>
    %c3_19 = arith.constant 3 : index
    %c0_20 = arith.constant 0 : index
    %c0_21 = arith.constant 0 : index
    %19 = vector.load %arg2[%c3_19, %c0_20, %c0_21] : memref<5x96x256xbf16, #tpu.memory_space<vmem>>, vector<1x96x256xbf16>
    %20 = vector.shape_cast %19 : vector<1x96x256xbf16> to vector<96x256xbf16>
    %cst_22 = arith.constant dense<0.000000e+00> : vector<64x256xf32>
    %21 = tpu.matmul %18, %20, %cst_22 {dimension_numbers = #tpu.dot_dimension_numbers<[1], [0], [0], [1], [0, 0, 1, 1], [], []>} : vector<64x96xbf16>, vector<96x256xbf16>, vector<64x256xf32> -> vector<64x256xf32>
    %22 = arith.addf %16, %21 : vector<64x256xf32>
    %c0_23 = arith.constant 0 : index
    %c4 = arith.constant 4 : index
    %c0_24 = arith.constant 0 : index
    %23 = vector.load %arg1[%c0_23, %c4, %c0_24] : memref<2x36x96xbf16, #tpu.memory_space<vmem>>, vector<2x32x96xbf16>
    %24 = vector.shape_cast %23 : vector<2x32x96xbf16> to vector<64x96xbf16>
    %c4_25 = arith.constant 4 : index
    %c0_26 = arith.constant 0 : index
    %c0_27 = arith.constant 0 : index
    %25 = vector.load %arg2[%c4_25, %c0_26, %c0_27] : memref<5x96x256xbf16, #tpu.memory_space<vmem>>, vector<1x96x256xbf16>
    %26 = vector.shape_cast %25 : vector<1x96x256xbf16> to vector<96x256xbf16>
    %cst_28 = arith.constant dense<0.000000e+00> : vector<64x256xf32>
    %27 = tpu.matmul %24, %26, %cst_28 {dimension_numbers = #tpu.dot_dimension_numbers<[1], [0], [0], [1], [0, 0, 1, 1], [], []>} : vector<64x96xbf16>, vector<96x256xbf16>, vector<64x256xf32> -> vector<64x256xf32>
    %28 = arith.addf %22, %27 : vector<64x256xf32>
    %29 = vector.extract_strided_slice %28 {offsets = [0, 0], sizes = [64, 128], strides = [1, 1]} : vector<64x256xf32> to vector<64x128xf32>
    %30 = vector.extract_strided_slice %28 {offsets = [0, 128], sizes = [64, 128], strides = [1, 1]} : vector<64x256xf32> to vector<64x128xf32>
    %31 = arith.maximumf %29, %30 : vector<64x128xf32>
    %c0_29 = arith.constant 0 : index
    %c0_30 = arith.constant 0 : index
    %32 = vector.load %arg9[%c0_29, %c0_30] : memref<64x128xf32, #tpu.memory_space<vmem>>, vector<64x128xf32>
    tpu.vector_store %arg9[%c0_29, %c0_30], %31 {strides = array<i32>} : memref<64x128xf32, #tpu.memory_space<vmem>>, vector<64x128xf32>,
    %c0_31 = arith.constant 0 : index
    %c0_32 = arith.constant 0 : index
    %33 = tpu.strided_load %arg9[%c0_31, %c0_32] {strides = array<i32: 2, 1>} : memref<64x128xf32, #tpu.memory_space<vmem>>, vector<32x128xf32>
    %c1_33 = arith.constant 1 : index
    %c0_34 = arith.constant 0 : index
    %34 = tpu.strided_load %arg9[%c1_33, %c0_34] {strides = array<i32: 2, 1>} : memref<64x128xf32, #tpu.memory_space<vmem>>, vector<32x128xf32>
    %35 = arith.maximumf %33, %34 : vector<32x128xf32>
    %c0_35 = arith.constant 0 : index
    %c0_36 = arith.constant 0 : index
    %36 = vector.load %arg3[%c0_35, %c0_36] : memref<1x128xf32, #tpu.memory_space<vmem>>, vector<1x128xf32>
    %37 = vector.broadcast %36 : vector<1x128xf32> to vector<32x128xf32>
    %38 = arith.addf %35, %37 : vector<32x128xf32>
    %cst_37 = arith.constant 0.000000e+00 : f32
    %39 = vector.broadcast %cst_37 : f32 to vector<32x128xf32>
    %40 = arith.maximumf %38, %39 : vector<32x128xf32>
    %41 = vector.shape_cast %40 : vector<32x128xf32> to vector<2x16x128xf32>
    %c0_38 = arith.constant 0 : index
    %c0_39 = arith.constant 0 : index
    %c0_40 = arith.constant 0 : index
    %42 = vector.load %arg10[%c0_38, %c0_39, %c0_40] : memref<2x24x128xf32, #tpu.memory_space<vmem>>, vector<2x16x128xf32>
    tpu.vector_store %arg10[%c0_38, %c0_39, %c0_40], %41 {strides = array<i32>} : memref<2x24x128xf32, #tpu.memory_space<vmem>>, vector<2x16x128xf32>,
    %cst_41 = arith.constant 0.000000e+00 : f32
    %43 = vector.broadcast %cst_41 : f32 to vector<2x8x128xf32>
    %c0_42 = arith.constant 0 : index
    %c16 = arith.constant 16 : index
    %c0_43 = arith.constant 0 : index
    %44 = vector.load %arg10[%c0_42, %c16, %c0_43] : memref<2x24x128xf32, #tpu.memory_space<vmem>>, vector<2x8x128xf32>
    tpu.vector_store %arg10[%c0_42, %c16, %c0_43], %43 {strides = array<i32>} : memref<2x24x128xf32, #tpu.memory_space<vmem>>, vector<2x8x128xf32>,
    %c0_44 = arith.constant 0 : index
    %c0_45 = arith.constant 0 : index
    %c0_46 = arith.constant 0 : index
    %45 = vector.load %arg10[%c0_44, %c0_45, %c0_46] : memref<2x24x128xf32, #tpu.memory_space<vmem>>, vector<2x16x128xf32>
    %46 = vector.shape_cast %45 : vector<2x16x128xf32> to vector<32x128xf32>
    %c0_47 = arith.constant 0 : index
    %c0_48 = arith.constant 0 : index
    %c0_49 = arith.constant 0 : index
    %47 = vector.load %arg4[%c0_47, %c0_48, %c0_49] : memref<5x128x256xf32, #tpu.memory_space<vmem>>, vector<1x128x256xf32>
    %48 = vector.shape_cast %47 : vector<1x128x256xf32> to vector<128x256xf32>
    %cst_50 = arith.constant dense<0.000000e+00> : vector<32x256xf32>
    %49 = tpu.matmul %46, %48, %cst_50 {dimension_numbers = #tpu.dot_dimension_numbers<[1], [0], [0], [1], [0, 0, 1, 1], [], []>} : vector<32x128xf32>, vector<128x256xf32>, vector<32x256xf32> -> vector<32x256xf32>
    %c0_51 = arith.constant 0 : index
    %c1_52 = arith.constant 1 : index
    %c0_53 = arith.constant 0 : index
    %50 = vector.load %arg10[%c0_51, %c1_52, %c0_53] : memref<2x24x128xf32, #tpu.memory_space<vmem>>, vector<2x16x128xf32>
    %51 = vector.shape_cast %50 : vector<2x16x128xf32> to vector<32x128xf32>
    %c1_54 = arith.constant 1 : index
    %c0_55 = arith.constant 0 : index
    %c0_56 = arith.constant 0 : index
    %52 = vector.load %arg4[%c1_54, %c0_55, %c0_56] : memref<5x128x256xf32, #tpu.memory_space<vmem>>, vector<1x128x256xf32>
    %53 = vector.shape_cast %52 : vector<1x128x256xf32> to vector<128x256xf32>
    %cst_57 = arith.constant dense<0.000000e+00> : vector<32x256xf32>
    %54 = tpu.matmul %51, %53, %cst_57 {dimension_numbers = #tpu.dot_dimension_numbers<[1], [0], [0], [1], [0, 0, 1, 1], [], []>} : vector<32x128xf32>, vector<128x256xf32>, vector<32x256xf32> -> vector<32x256xf32>
    %55 = arith.addf %49, %54 : vector<32x256xf32>
    %c0_58 = arith.constant 0 : index
    %c2_59 = arith.constant 2 : index
    %c0_60 = arith.constant 0 : index
    %56 = vector.load %arg10[%c0_58, %c2_59, %c0_60] : memref<2x24x128xf32, #tpu.memory_space<vmem>>, vector<2x16x128xf32>
    %57 = vector.shape_cast %56 : vector<2x16x128xf32> to vector<32x128xf32>
    %c2_61 = arith.constant 2 : index
    %c0_62 = arith.constant 0 : index
    %c0_63 = arith.constant 0 : index
    %58 = vector.load %arg4[%c2_61, %c0_62, %c0_63] : memref<5x128x256xf32, #tpu.memory_space<vmem>>, vector<1x128x256xf32>
    %59 = vector.shape_cast %58 : vector<1x128x256xf32> to vector<128x256xf32>
    %cst_64 = arith.constant dense<0.000000e+00> : vector<32x256xf32>
    %60 = tpu.matmul %57, %59, %cst_64 {dimension_numbers = #tpu.dot_dimension_numbers<[1], [0], [0], [1], [0, 0, 1, 1], [], []>} : vector<32x128xf32>, vector<128x256xf32>, vector<32x256xf32> -> vector<32x256xf32>
    %61 = arith.addf %55, %60 : vector<32x256xf32>
    %c0_65 = arith.constant 0 : index
    %c3_66 = arith.constant 3 : index
    %c0_67 = arith.constant 0 : index
    %62 = vector.load %arg10[%c0_65, %c3_66, %c0_67] : memref<2x24x128xf32, #tpu.memory_space<vmem>>, vector<2x16x128xf32>
    %63 = vector.shape_cast %62 : vector<2x16x128xf32> to vector<32x128xf32>
    %c3_68 = arith.constant 3 : index
    %c0_69 = arith.constant 0 : index
    %c0_70 = arith.constant 0 : index
    %64 = vector.load %arg4[%c3_68, %c0_69, %c0_70] : memref<5x128x256xf32, #tpu.memory_space<vmem>>, vector<1x128x256xf32>
    %65 = vector.shape_cast %64 : vector<1x128x256xf32> to vector<128x256xf32>
    %cst_71 = arith.constant dense<0.000000e+00> : vector<32x256xf32>
    %66 = tpu.matmul %63, %65, %cst_71 {dimension_numbers = #tpu.dot_dimension_numbers<[1], [0], [0], [1], [0, 0, 1, 1], [], []>} : vector<32x128xf32>, vector<128x256xf32>, vector<32x256xf32> -> vector<32x256xf32>
    %67 = arith.addf %61, %66 : vector<32x256xf32>
    %c0_72 = arith.constant 0 : index
    %c4_73 = arith.constant 4 : index
    %c0_74 = arith.constant 0 : index
    %68 = vector.load %arg10[%c0_72, %c4_73, %c0_74] : memref<2x24x128xf32, #tpu.memory_space<vmem>>, vector<2x16x128xf32>
    %69 = vector.shape_cast %68 : vector<2x16x128xf32> to vector<32x128xf32>
    %c4_75 = arith.constant 4 : index
    %c0_76 = arith.constant 0 : index
    %c0_77 = arith.constant 0 : index
    %70 = vector.load %arg4[%c4_75, %c0_76, %c0_77] : memref<5x128x256xf32, #tpu.memory_space<vmem>>, vector<1x128x256xf32>
    %71 = vector.shape_cast %70 : vector<1x128x256xf32> to vector<128x256xf32>
    %cst_78 = arith.constant dense<0.000000e+00> : vector<32x256xf32>
    %72 = tpu.matmul %69, %71, %cst_78 {dimension_numbers = #tpu.dot_dimension_numbers<[1], [0], [0], [1], [0, 0, 1, 1], [], []>} : vector<32x128xf32>, vector<128x256xf32>, vector<32x256xf32> -> vector<32x256xf32>
    %73 = arith.addf %67, %72 : vector<32x256xf32>
    %74 = vector.extract_strided_slice %73 {offsets = [0, 0], sizes = [32, 128], strides = [1, 1]} : vector<32x256xf32> to vector<32x128xf32>
    %75 = vector.extract_strided_slice %73 {offsets = [0, 128], sizes = [32, 128], strides = [1, 1]} : vector<32x256xf32> to vector<32x128xf32>
    %76 = arith.maximumf %74, %75 : vector<32x128xf32>
    %77 = vector.shape_cast %76 : vector<32x128xf32> to vector<2x16x128xf32>
    %c0_79 = arith.constant 0 : index
    %c0_80 = arith.constant 0 : index
    %c0_81 = arith.constant 0 : index
    %78 = vector.load %arg11[%c0_79, %c0_80, %c0_81] : memref<2x16x128xf32, #tpu.memory_space<vmem>>, vector<2x16x128xf32>
    tpu.vector_store %arg11[%c0_79, %c0_80, %c0_81], %77 {strides = array<i32>} : memref<2x16x128xf32, #tpu.memory_space<vmem>>, vector<2x16x128xf32>,
    %c0_82 = arith.constant 0 : index
    %c0_83 = arith.constant 0 : index
    %c0_84 = arith.constant 0 : index
    %79 = vector.load %arg11[%c0_82, %c0_83, %c0_84] : memref<2x16x128xf32, #tpu.memory_space<vmem>>, vector<2x1x128xf32>
    %80 = vector.shape_cast %79 : vector<2x1x128xf32> to vector<2x128xf32>
    %c0_85 = arith.constant 0 : index
    %c1_86 = arith.constant 1 : index
    %c0_87 = arith.constant 0 : index
    %81 = vector.load %arg11[%c0_85, %c1_86, %c0_87] : memref<2x16x128xf32, #tpu.memory_space<vmem>>, vector<2x1x128xf32>
    %82 = vector.shape_cast %81 : vector<2x1x128xf32> to vector<2x128xf32>
    %83 = arith.maximumf %80, %82 : vector<2x128xf32>
    %c0_88 = arith.constant 0 : index
    %c0_89 = arith.constant 0 : index
    %84 = vector.load %arg5[%c0_88, %c0_89] : memref<1x128xf32, #tpu.memory_space<vmem>>, vector<1x128xf32>
    %85 = vector.broadcast %84 : vector<1x128xf32> to vector<2x128xf32>
    %86 = arith.addf %83, %85 : vector<2x128xf32>
    %cst_90 = arith.constant 0.000000e+00 : f32
    %87 = vector.broadcast %cst_90 : f32 to vector<2x128xf32>
    %88 = arith.maximumf %86, %87 : vector<2x128xf32>
    %c0_91 = arith.constant 0 : index
    %c0_92 = arith.constant 0 : index
    %c0_93 = arith.constant 0 : index
    %89 = vector.load %arg6[%c0_91, %c0_92, %c0_93] : memref<5x128x128xf32, #tpu.memory_space<vmem>>, vector<1x128x128xf32>
    %90 = vector.shape_cast %89 : vector<1x128x128xf32> to vector<128x128xf32>
    %cst_94 = arith.constant dense<0.000000e+00> : vector<2x128xf32>
    %91 = tpu.matmul %88, %90, %cst_94 {dimension_numbers = #tpu.dot_dimension_numbers<[1], [0], [0], [1], [0, 0, 1, 1], [], []>} : vector<2x128xf32>, vector<128x128xf32>, vector<2x128xf32> -> vector<2x128xf32>
    %c0_95 = arith.constant 0 : index
    %c2_96 = arith.constant 2 : index
    %c0_97 = arith.constant 0 : index
    %92 = vector.load %arg11[%c0_95, %c2_96, %c0_97] : memref<2x16x128xf32, #tpu.memory_space<vmem>>, vector<2x1x128xf32>
    %93 = vector.shape_cast %92 : vector<2x1x128xf32> to vector<2x128xf32>
    %c0_98 = arith.constant 0 : index
    %c3_99 = arith.constant 3 : index
    %c0_100 = arith.constant 0 : index
    %94 = vector.load %arg11[%c0_98, %c3_99, %c0_100] : memref<2x16x128xf32, #tpu.memory_space<vmem>>, vector<2x1x128xf32>
    %95 = vector.shape_cast %94 : vector<2x1x128xf32> to vector<2x128xf32>
    %96 = arith.maximumf %93, %95 : vector<2x128xf32>
    %c0_101 = arith.constant 0 : index
    %c0_102 = arith.constant 0 : index
    %97 = vector.load %arg5[%c0_101, %c0_102] : memref<1x128xf32, #tpu.memory_space<vmem>>, vector<1x128xf32>
    %98 = vector.broadcast %97 : vector<1x128xf32> to vector<2x128xf32>
    %99 = arith.addf %96, %98 : vector<2x128xf32>
    %cst_103 = arith.constant 0.000000e+00 : f32
    %100 = vector.broadcast %cst_103 : f32 to vector<2x128xf32>
    %101 = arith.maximumf %99, %100 : vector<2x128xf32>
    %c1_104 = arith.constant 1 : index
    %c0_105 = arith.constant 0 : index
    %c0_106 = arith.constant 0 : index
    %102 = vector.load %arg6[%c1_104, %c0_105, %c0_106] : memref<5x128x128xf32, #tpu.memory_space<vmem>>, vector<1x128x128xf32>
    %103 = vector.shape_cast %102 : vector<1x128x128xf32> to vector<128x128xf32>
    %cst_107 = arith.constant dense<0.000000e+00> : vector<2x128xf32>
    %104 = tpu.matmul %101, %103, %cst_107 {dimension_numbers = #tpu.dot_dimension_numbers<[1], [0], [0], [1], [0, 0, 1, 1], [], []>} : vector<2x128xf32>, vector<128x128xf32>, vector<2x128xf32> -> vector<2x128xf32>
    %105 = arith.addf %91, %104 : vector<2x128xf32>
    %c0_108 = arith.constant 0 : index
    %c4_109 = arith.constant 4 : index
    %c0_110 = arith.constant 0 : index
    %106 = vector.load %arg11[%c0_108, %c4_109, %c0_110] : memref<2x16x128xf32, #tpu.memory_space<vmem>>, vector<2x1x128xf32>
    %107 = vector.shape_cast %106 : vector<2x1x128xf32> to vector<2x128xf32>
    %c0_111 = arith.constant 0 : index
    %c5 = arith.constant 5 : index
    %c0_112 = arith.constant 0 : index
    %108 = vector.load %arg11[%c0_111, %c5, %c0_112] : memref<2x16x128xf32, #tpu.memory_space<vmem>>, vector<2x1x128xf32>
    %109 = vector.shape_cast %108 : vector<2x1x128xf32> to vector<2x128xf32>
    %110 = arith.maximumf %107, %109 : vector<2x128xf32>
    %c0_113 = arith.constant 0 : index
    %c0_114 = arith.constant 0 : index
    %111 = vector.load %arg5[%c0_113, %c0_114] : memref<1x128xf32, #tpu.memory_space<vmem>>, vector<1x128xf32>
    %112 = vector.broadcast %111 : vector<1x128xf32> to vector<2x128xf32>
    %113 = arith.addf %110, %112 : vector<2x128xf32>
    %cst_115 = arith.constant 0.000000e+00 : f32
    %114 = vector.broadcast %cst_115 : f32 to vector<2x128xf32>
    %115 = arith.maximumf %113, %114 : vector<2x128xf32>
    %c2_116 = arith.constant 2 : index
    %c0_117 = arith.constant 0 : index
    %c0_118 = arith.constant 0 : index
    %116 = vector.load %arg6[%c2_116, %c0_117, %c0_118] : memref<5x128x128xf32, #tpu.memory_space<vmem>>, vector<1x128x128xf32>
    %117 = vector.shape_cast %116 : vector<1x128x128xf32> to vector<128x128xf32>
    %cst_119 = arith.constant dense<0.000000e+00> : vector<2x128xf32>
    %118 = tpu.matmul %115, %117, %cst_119 {dimension_numbers = #tpu.dot_dimension_numbers<[1], [0], [0], [1], [0, 0, 1, 1], [], []>} : vector<2x128xf32>, vector<128x128xf32>, vector<2x128xf32> -> vector<2x128xf32>
    %119 = arith.addf %105, %118 : vector<2x128xf32>
    %c0_120 = arith.constant 0 : index
    %c6 = arith.constant 6 : index
    %c0_121 = arith.constant 0 : index
    %120 = vector.load %arg11[%c0_120, %c6, %c0_121] : memref<2x16x128xf32, #tpu.memory_space<vmem>>, vector<2x1x128xf32>
    %121 = vector.shape_cast %120 : vector<2x1x128xf32> to vector<2x128xf32>
    %c0_122 = arith.constant 0 : index
    %c7 = arith.constant 7 : index
    %c0_123 = arith.constant 0 : index
    %122 = vector.load %arg11[%c0_122, %c7, %c0_123] : memref<2x16x128xf32, #tpu.memory_space<vmem>>, vector<2x1x128xf32>
    %123 = vector.shape_cast %122 : vector<2x1x128xf32> to vector<2x128xf32>
    %124 = arith.maximumf %121, %123 : vector<2x128xf32>
    %c0_124 = arith.constant 0 : index
    %c0_125 = arith.constant 0 : index
    %125 = vector.load %arg5[%c0_124, %c0_125] : memref<1x128xf32, #tpu.memory_space<vmem>>, vector<1x128xf32>
    %126 = vector.broadcast %125 : vector<1x128xf32> to vector<2x128xf32>
    %127 = arith.addf %124, %126 : vector<2x128xf32>
    %cst_126 = arith.constant 0.000000e+00 : f32
    %128 = vector.broadcast %cst_126 : f32 to vector<2x128xf32>
    %129 = arith.maximumf %127, %128 : vector<2x128xf32>
    %c3_127 = arith.constant 3 : index
    %c0_128 = arith.constant 0 : index
    %c0_129 = arith.constant 0 : index
    %130 = vector.load %arg6[%c3_127, %c0_128, %c0_129] : memref<5x128x128xf32, #tpu.memory_space<vmem>>, vector<1x128x128xf32>
    %131 = vector.shape_cast %130 : vector<1x128x128xf32> to vector<128x128xf32>
    %cst_130 = arith.constant dense<0.000000e+00> : vector<2x128xf32>
    %132 = tpu.matmul %129, %131, %cst_130 {dimension_numbers = #tpu.dot_dimension_numbers<[1], [0], [0], [1], [0, 0, 1, 1], [], []>} : vector<2x128xf32>, vector<128x128xf32>, vector<2x128xf32> -> vector<2x128xf32>
    %133 = arith.addf %119, %132 : vector<2x128xf32>
    %c0_131 = arith.constant 0 : index
    %c8 = arith.constant 8 : index
    %c0_132 = arith.constant 0 : index
    %134 = vector.load %arg11[%c0_131, %c8, %c0_132] : memref<2x16x128xf32, #tpu.memory_space<vmem>>, vector<2x1x128xf32>
    %135 = vector.shape_cast %134 : vector<2x1x128xf32> to vector<2x128xf32>
    %c0_133 = arith.constant 0 : index
    %c9 = arith.constant 9 : index
    %c0_134 = arith.constant 0 : index
    %136 = vector.load %arg11[%c0_133, %c9, %c0_134] : memref<2x16x128xf32, #tpu.memory_space<vmem>>, vector<2x1x128xf32>
    %137 = vector.shape_cast %136 : vector<2x1x128xf32> to vector<2x128xf32>
    %138 = arith.maximumf %135, %137 : vector<2x128xf32>
    %c0_135 = arith.constant 0 : index
    %c0_136 = arith.constant 0 : index
    %139 = vector.load %arg5[%c0_135, %c0_136] : memref<1x128xf32, #tpu.memory_space<vmem>>, vector<1x128xf32>
    %140 = vector.broadcast %139 : vector<1x128xf32> to vector<2x128xf32>
    %141 = arith.addf %138, %140 : vector<2x128xf32>
    %cst_137 = arith.constant 0.000000e+00 : f32
    %142 = vector.broadcast %cst_137 : f32 to vector<2x128xf32>
    %143 = arith.maximumf %141, %142 : vector<2x128xf32>
    %c4_138 = arith.constant 4 : index
    %c0_139 = arith.constant 0 : index
    %c0_140 = arith.constant 0 : index
    %144 = vector.load %arg6[%c4_138, %c0_139, %c0_140] : memref<5x128x128xf32, #tpu.memory_space<vmem>>, vector<1x128x128xf32>
    %145 = vector.shape_cast %144 : vector<1x128x128xf32> to vector<128x128xf32>
    %cst_141 = arith.constant dense<0.000000e+00> : vector<2x128xf32>
    %146 = tpu.matmul %143, %145, %cst_141 {dimension_numbers = #tpu.dot_dimension_numbers<[1], [0], [0], [1], [0, 0, 1, 1], [], []>} : vector<2x128xf32>, vector<128x128xf32>, vector<2x128xf32> -> vector<2x128xf32>
    %147 = arith.addf %133, %146 : vector<2x128xf32>
    %c0_142 = arith.constant 0 : index
    %c0_143 = arith.constant 0 : index
    %148 = vector.load %arg7[%c0_142, %c0_143] : memref<1x128xf32, #tpu.memory_space<vmem>>, vector<1x128xf32>
    %149 = vector.broadcast %148 : vector<1x128xf32> to vector<2x128xf32>
    %150 = arith.addf %147, %149 : vector<2x128xf32>
    %cst_144 = arith.constant 0.000000e+00 : f32
    %151 = vector.broadcast %cst_144 : f32 to vector<2x128xf32>
    %152 = arith.maximumf %150, %151 : vector<2x128xf32>
    %c0_145 = arith.constant 0 : index
    %c0_146 = arith.constant 0 : index
    %153 = vector.load %arg8[%c0_145, %c0_146] : memref<2x128xf32, #tpu.memory_space<vmem>>, vector<2x128xf32>
    tpu.vector_store %arg8[%c0_145, %c0_146], %152 {strides = array<i32>} : memref<2x128xf32, #tpu.memory_space<vmem>>, vector<2x128xf32>,
    return
  }
  func.func @transform_0(%arg0: i32) -> (i32, i32, i32) {
    %c0_i32 = arith.constant 0 : i32
    %c0_i32_0 = arith.constant 0 : i32
    %c0_i32_1 = arith.constant 0 : i32
    return %arg0, %c0_i32, %c0_i32_0 : i32, i32, i32
  }
  func.func @transform_1(%arg0: i32) -> (i32, i32, i32) {
    %c0_i32 = arith.constant 0 : i32
    %c0_i32_0 = arith.constant 0 : i32
    %c0_i32_1 = arith.constant 0 : i32
    %c0_i32_2 = arith.constant 0 : i32
    return %c0_i32, %c0_i32_0, %c0_i32_1 : i32, i32, i32
  }
  func.func @transform_2(%arg0: i32) -> (i32, i32) {
    %c0_i32 = arith.constant 0 : i32
    %c0_i32_0 = arith.constant 0 : i32
    %c0_i32_1 = arith.constant 0 : i32
    return %c0_i32, %c0_i32_0 : i32, i32
  }
  func.func @transform_3(%arg0: i32) -> (i32, i32, i32) {
    %c0_i32 = arith.constant 0 : i32
    %c0_i32_0 = arith.constant 0 : i32
    %c0_i32_1 = arith.constant 0 : i32
    %c0_i32_2 = arith.constant 0 : i32
    return %c0_i32, %c0_i32_0, %c0_i32_1 : i32, i32, i32
  }
  func.func @transform_4(%arg0: i32) -> (i32, i32) {
    %c0_i32 = arith.constant 0 : i32
    %c0_i32_0 = arith.constant 0 : i32
    %c0_i32_1 = arith.constant 0 : i32
    return %c0_i32, %c0_i32_0 : i32, i32
  }
  func.func @transform_5(%arg0: i32) -> (i32, i32, i32) {
    %c0_i32 = arith.constant 0 : i32
    %c0_i32_0 = arith.constant 0 : i32
    %c0_i32_1 = arith.constant 0 : i32
    %c0_i32_2 = arith.constant 0 : i32
    return %c0_i32, %c0_i32_0, %c0_i32_1 : i32, i32, i32
  }
  func.func @transform_6(%arg0: i32) -> (i32, i32) {
    %c0_i32 = arith.constant 0 : i32
    %c0_i32_0 = arith.constant 0 : i32
    %c0_i32_1 = arith.constant 0 : i32
    return %c0_i32, %c0_i32_0 : i32, i32
  }
  func.func @transform_7(%arg0: i32) -> (i32, i32) {
    %c0_i32 = arith.constant 0 : i32
    %c0_i32_0 = arith.constant 0 : i32
    return %arg0, %c0_i32 : i32, i32
  }
}

</mosaic_0001>

<bundles_post_ra>
// kernel: forward.1
= control target key start
LH: loop header
LB: loop body
LE: loop exit
PB: predicated region body
PF: predicated region fallthrough
CT: control target
= control target key end

     0   :  { %v3544_v2 = vmov 0   ;;  %vm50_vm0 = vsmask.f32 3328  ;;  %vm51_vm1 = vsmask.f32 7440  ;;  %vm226_vm3 = vcmask 785408   ;;  %s5022_s0 = inlined_call_operand.vmem [shape: bf16[2,36,96], index: 0, kind: input, shape index: {}]   ;;  %s5023_s1 = inlined_call_operand.vmem [shape: bf16[5,96,256], index: 1, kind: input, shape index: {}]   ;;  %s5024_s2 = inlined_call_operand.vmem [shape: f32[1,128], index: 2, kind: input, shape index: {}]   ;;  %s5025_s3 = inlined_call_operand.vmem [shape: f32[5,128,256], index: 3, kind: input, shape index: {}]   ;;  %s5026_s4 = inlined_call_operand.vmem [shape: f32[1,128], index: 4, kind: input, shape index: {}]   ;;  %s5027_s5 = inlined_call_operand.vmem [shape: f32[5,128,128], index: 5, kind: input, shape index: {}]   ;;  %s5028_s6 = inlined_call_operand.vmem [shape: f32[1,128], index: 6, kind: input, shape index: {}]   ;;  %s5029_s7 = inlined_call_operand.hbm [shape: f32[2,128], index: 7, kind: output, shape index: {}]  }
   0x1   :  { %v3425_v0 = vld [vmem:[%s5023_s1 + $0x64] ss:$8 sps:$4 sm:$0xff]   ;;  %v3427_v1 = vld [vmem:[%s5023_s1 + $0x60] ss:$8 sps:$4 sm:$0xff]   ;;  %271 = vmatprep.mubr.bf16.mxu0 %v3544_v2  ;;  %v3428_v3 = vld [vmem:[%s5023_s1 + $0x74] ss:$8 sps:$4 sm:$0xff]  }
   0x2   :  { %239 = vmatprep.subr.bf16.mxu0 %v3425_v0  ;;  %v3430_v4 = vld [vmem:[%s5023_s1 + $0x70] ss:$8 sps:$4 sm:$0xff]   ;;  %v3431_v5 = vld [vmem:[%s5023_s1 + $0x84] ss:$8 sps:$4 sm:$0xff]   ;;  %v3433_v6 = vld [vmem:[%s5023_s1 + $0x80] ss:$8 sps:$4 sm:$0xff]  }
   0x3   :  { %240 = vmatpush1.bf16.msra.mxu0 %v3427_v1  ;;  %v3434_v7 = vld [vmem:[%s5023_s1 + $0x94] ss:$8 sps:$4 sm:$0xff]   ;;  %v3614_v8 = vld [vmem:[%s5022_s0] sm:$0xf]  ;;  %v3619_v9 = vld [vmem:[%s5022_s0 + $0x4] sm:$0xf] }
   0x4   :  { %241 = vmatprep.subr.bf16.mxu0 %v3428_v3  ;;  %v3624_v10 = vld [vmem:[%s5022_s0 + $0x8] sm:$0xf]  ;;  %v54_v11 = vshrl.u32 %v3614_v8, 16  ;;  %v57_v12 = vshll.u32 %v3614_v8, 16  ;;  %v63_v13 = vshll.u32 %v3619_v9, 16  ;;  %v67_v14 = vshrl.u32 %v3619_v9, 16  ;;  %vm3647_vm2 = vmor %vm50_vm0, %vm51_vm1 }
   0x5   :  { %v3436_v15 = vld [vmem:[%s5023_s1 + $0x90] ss:$8 sps:$4 sm:$0xff]   ;;  %v73_v16 = vshll.u32 %v3624_v10, 16  ;;  %v3437_v21 = vld [vmem:[%s5023_s1 + $0xa4] ss:$8 sps:$4 sm:$0xff]   ;;  %v77_v32 = vshrl.u32 %v3624_v10, 16 }
   0x6   :  { %v56_v17 = vrot.slane %v54_v11, 4  ;;  %v59_v18 = vrot.slane %v57_v12, 5  ;;  %v65_v19 = vrot.slane %v63_v13, 5  ;;  %v69_v20 = vrot.slane %v67_v14, 4  ;;  %v3439_v24 = vld [vmem:[%s5023_s1 + $0xa0] ss:$8 sps:$4 sm:$0xff]  }
   0x7   :  { %242 = vmatpush1.bf16.msra.mxu0 %v3430_v4  ;;  %v712_v22 = vrot.slane %v67_v14, 5  ;;  %v713_v23 = vrot.slane %v63_v13, 6  ;;  %v75_v27 = vrot.slane %v73_v16, 5  ;;  %v3643_v28 = vld [vmem:[%s5022_s0 + $0xc] sm:$0xf]  ;;  %v718_v38 = vrot.slane %v73_v16, 6 }
   0x8   :  { %243 = vmatprep.subr.bf16.mxu0 %v3431_v5  ;;  %v60_v25 = vor.u32 %v59_v18, %v56_v17  ;;  %v70_v26 = vor.u32 %v69_v20, %v65_v19  ;;  %v3656_v31 = vld [vmem:[%s5022_s0 + $0x10] sm:$0x1]  ;;  %v83_v33 = vshll.u32 %v3643_v28, 16  ;;  %v87_v34 = vshrl.u32 %v3643_v28, 16  ;;  %v3440_v35 = vld [vmem:[%s5023_s1 + $0xb4] ss:$8 sps:$4 sm:$0xff]  }
   0x9   :  { %v3651_v30 = vor.u32 %v713_v23, %v712_v22  ;;  %v79_v39 = vrot.slane %v77_v32, 4  ;;  %v3671_v42 = vld [vmem:[%s5022_s0 + $0x14] sm:$0xf]  ;;  %v93_v44 = vshll.u32 %v3656_v31, 16  ;;  %v717_v45 = vrot.slane %v77_v32, 5 }
   0xa   :  { %v61_v36 = vrot.slane %v60_v25, 4  ;;  %v71_v37 = vrot.slane %v70_v26, 4  ;;  %v85_v40 = vrot.slane %v83_v33, 5  ;;  %v89_v41 = vrot.slane %v87_v34, 4  ;;  %v3679_v46 = vld [vmem:[%s5022_s0 + $0x18] sm:$0xf] }
   0xb   :  { %244 = vmatpush1.bf16.msra.mxu0 %v3433_v6  ;;  %v3442_v47 = vld [vmem:[%s5023_s1 + $0xb0] ss:$8 sps:$4 sm:$0xff]   ;;  %v80_v49 = vor.u32 %v79_v39, %v75_v27  ;;  %v98_v51 = vshrl.u32 %v3671_v42, 16  ;;  %v3687_v52 = vor.u32 %v718_v38, %v717_v45  ;;  %v101_v53 = vshll.u32 %v3671_v42, 16  ;;  %v3445_v56 = vld [vmem:[%s5023_s1 + $0x4] ss:$8 sps:$4 sm:$0xff]  }
   0xc   :  { %245 = vmatprep.subr.bf16.mxu0 %v3434_v7  ;;  %v66_v43 = vsel %vm3647_vm2, %v61_v36, %v65_v19  ;;  %v76_v48 = vsel %vm3647_vm2, %v71_v37, %v75_v27  ;;  %v90_v50 = vor.u32 %v89_v41, %v85_v40  ;;  %v107_v54 = vshll.u32 %v3679_v46, 16  ;;  %v3443_v59 = vld [vmem:[%s5023_s1] ss:$8 sps:$4 sm:$0xff]   ;;  %v3448_v4 = vld [vmem:[%s5023_s1 + $0x14] ss:$8 sps:$4 sm:$0xff]  }
   0xd   :  { %v111_v55 = vshrl.u32 %v3679_v46, 16  ;;  %v95_v57 = vrot.slane %v93_v44, 5  ;;  %v2449_v58 = vcombine.low %v66_v43, %v76_v48  ;;  %v81_v60 = vrot.slane %v80_v49, 4  ;;  %v3707_v3 = vld [vmem:[%s5022_s0 + $0x20] sm:$0xf] }
   0xe   :  { %v100_v61 = vrot.slane %v98_v51, 4  ;;  %v103_v62 = vrot.slane %v101_v53, 5  ;;  %v91_v63 = vrot.slane %v90_v50, 4  ;;  %v3700_v0 = vrot.slane %v107_v54, 5  ;;  %v3715_v5 = vld [vmem:[%s5022_s0 + $0x1c] sm:$0xf] }
   0xf   :  { %246 = vmatpush1.bf16.msra.mxu0 %v3436_v15  ;;  %v113_v1 = vrot.slane %v111_v55, 4  ;;  %v121_v6 = vshrl.u32 %v3715_v5, 16  ;;  %vm483_vm4 = vcmask 1042432   ;;  %v127_v11 = vshll.u32 %v3707_v3, 16  ;;  %v3446_v13 = vld [vmem:[%s5023_s1 + $0x10] ss:$8 sps:$4 sm:$0xff]  }
  0x10   :  { %247 = vmatprep.subr.bf16.mxu0 %v3437_v21  ;;  %v104_v7 = vor.u32 %v103_v62, %v100_v61  ;;  %v131_v12 = vshrl.u32 %v3707_v3, 16  ;;  %vm484_vm5 = vcmask 1046532   ;;  %v86_v14 = vsel %vm3647_vm2, %v81_v60, %v85_v40  ;;  %v3451_v18 = vld [vmem:[%s5023_s1 + $0x24] ss:$8 sps:$4 sm:$0xff]   ;;  %v3449_v20 = vld [vmem:[%s5023_s1 + $0x20] ss:$8 sps:$4 sm:$0xff]  }
  0x11   :  { %v96_v15 = vsel %vm3647_vm2, %v91_v63, %v95_v57  ;;  %v114_v16 = vor.u32 %v113_v1, %v3700_v0  ;;  %v117_v17 = vshll.u32 %v3715_v5, 16  ;;  %v488_v19 = vrot.slane %v3619_v9, 5  ;;  %v3741_v21 = vld [vmem:[%s5022_s0 + $0x24] sm:$0x1]  ;;  %v3454_v27 = vld [vmem:[%s5023_s1 + $0x34] ss:$8 sps:$4 sm:$0xff]   ;;  %vm3758_vm6 = vmor %vm483_vm4, %vm484_vm5 }
  0x12   :  { %v123_v22 = vrot.slane %v121_v6, 4  ;;  %v491_v23 = vrot.slane %v3624_v10, 5  ;;  %v2450_v25 = vcombine.low %v86_v14, %v96_v15  ;;  %v105_v26 = vrot.slane %v104_v7, 4  ;;  %v477_v43 = vld [vmem:[%s5022_s0] sm:$0xe] }
  0x13   :  { %248 = vmatpush1.bf16.msra.mxu0 %v3439_v24  ;;  %v494_v24 = vrot.slane %v3643_v28, 5  ;;  %v3752_v32 = vrot.slane %v127_v11, 5  ;;  %v115_v37 = vrot.slane %v114_v16, 4  ;;  %v119_v38 = vrot.slane %v117_v17, 5  ;;  %v3457_v61 = vld [vmem:[%s5023_s1 + $0x44] ss:$8 sps:$4 sm:$0xff]  }
  0x14   :  { %249 = vmatprep.subr.bf16.mxu0 %v3440_v35  ;;  %v133_v35 = vrot.slane %v131_v12, 4  ;;  %v490_v39 = vrot.slane %v488_v19, 4  ;;  %v493_v40 = vrot.slane %v491_v23, 4  ;;  %vm700_vm7 = vsmask.f32 2304 }
  0x15   :  { %v137_v41 = vshll.u32 %v3741_v21, 16  ;;  %v496_v44 = vrot.slane %v494_v24, 4  ;;  %v124_v45 = vor.u32 %v123_v22, %v119_v38  ;;  %v110_v50 = vsel %vm3647_vm2, %v105_v26, %v3700_v0  ;;  %v478_v1 = vld [vmem:[%s5022_s0 + $0x14] sm:$0xe]  ;;  %v3455_v22 = vld [vmem:[%s5023_s1 + $0x40] ss:$8 sps:$4 sm:$0xff]  }
  0x16   :  { %v3770_v48 = vsel %vm3758_vm6, %v490_v39, %v491_v23  ;;  %v3774_v49 = vsel %vm3758_vm6, %v493_v40, %v494_v24  ;;  %v134_v51 = vor.u32 %v133_v35, %v3752_v32  ;;  %v497_v53 = vrot.slane %v3656_v31, 5  ;;  %v3460_v26 = vld [vmem:[%s5023_s1 + $0x54] ss:$8 sps:$4 sm:$0xff]   ;;  %v3464_v29 = vld [vmem:[%s5023_s1 + $0xc4] ss:$8 sps:$4 sm:$0xff]  }
  0x17   :  { %250 = vmatpush1.bf16.msra.mxu0 %v3442_v47  ;;  %v2489_v47 = vrot.slane %v477_v43, 9  ;;  %v120_v57 = vsel %vm3647_vm2, %v115_v37, %v119_v38  ;;  %v504_v60 = vrot.slane %v3715_v5, 5  ;;  %v507_v31 = vrot.slane %v3707_v3, 5 }
  0x18   :  { %404 = vmatprep.subr.bf16.mxu0 %v3445_v56  ;;  %v501_v56 = vrot.slane %v3679_v46, 5  ;;  %v139_v62 = vrot.slane %v137_v41, 5  ;;  %v3802_v0 = vsel %vm3758_vm6, %v496_v44, %v497_v53  ;;  %v2451_v15 = vcombine.low %v110_v50, %v120_v57  ;;  %v3458_v41 = vld [vmem:[%s5023_s1 + $0x50] ss:$8 sps:$4 sm:$0xff]  }
  0x19   :  { %v2504_v7 = vcombine.low %v3774_v49, %v3802_v0  ;;  %v135_v16 = vrot.slane %v134_v51, 4  ;;  %v704_v37 = vshrl.u32 %v477_v43, 16  ;;  %vm701_vm8 = vsmask.f32 6416  ;;  %v3864_v51 = vld [vmem:[%s5022_s0 + $0x10] sm:$0x3] }
  0x1a   :  { %2465 = vmatmul.mubr.msk.bf16.vlgmr.msra.gmra.mrb[0].mxu0 %vm226_vm3, %v2449_v58  ;;  %v3452_v58 = vld [vmem:[%s5023_s1 + $0x30] ss:$8 sps:$4 sm:$0xff]   ;;  %v503_v14 = vrot.slane %v501_v56, 4  ;;  %v707_v39 = vshll.u32 %v477_v43, 16  ;;  %vm3847_vm9 = vmor %vm700_vm7, %vm701_vm8  ;;  %v2469_v50 = vcombine.low %v3614_v8, %v3619_v9  ;;  %v722_v53 = vrot.slane %v87_v34, 5 }
  0x1b   :  { %405 = vmatpush1.bf16.msra.mxu0 %v3443_v59  ;;  %281 = vmatprep.mubr.bf16.mxu0 %v3544_v2  ;;  %v3791_v59 = vsel %vm3758_vm6, %v2489_v47, %v488_v19  ;;  %v509_v19 = vrot.slane %v507_v31, 4  ;;  %v140_v40 = vsel %vm3647_vm2, %v135_v16, %v139_v62  ;;  %v706_v43 = vrot.slane %v704_v37, 5  ;;  %v3893_v37 = vld [vmem:[%s5022_s0 + $0x24] sm:$0x3] }
  0x1c   :  { %406 = vmatprep.subr.bf16.mxu0 %v3448_v4  ;;  %v2503_v63 = vcombine.low %v3791_v59, %v3770_v48  ;;  %v125_v4 = vrot.slane %v124_v45, 4  ;;  %v3819_v24 = vsel %vm3758_vm6, %v503_v14, %v504_v60  ;;  %v721_v47 = vrot.slane %v3687_v52, 4 }
  0x1d   :  { %v740_v62 = vshll.u32 %v478_v1, 16  ;;  %v746_v34 = vrot.slane %v107_v54, 6  ;;  %vm961_vm10 = vcmask 1041408   ;;  %vm962_vm11 = vcmask 1045508  }
  0x1e   :  { %vm3918_vm12 = vmor %vm961_vm10, %vm962_vm11 }
  0x1f   :  { %407 = vmatpush1.bf16.msra.mxu0 %v3446_v13  ;;  %v2490_v13 = vrot.slane %v478_v1, 9 }
  0x20   :  { %408 = vmatprep.subr.bf16.mxu0 %v3451_v18  ;;  %v506_v18 = vrot.slane %v504_v60, 4  ;;  %v728_v60 = vshrl.u32 %v3864_v51, 16 }
  0x21   :  { %v3815_v23 = vsel %vm3758_vm6, %v2490_v13, %v501_v56  ;;  %v723_v56 = vrot.slane %v83_v33, 6 }
  0x22   :  { %2466 = vmatmul.mubr.msk.bf16.gmra.mrb[4].mxu0 %vm226_vm3, %v2450_v25  ;;  %v510_v25 = vrot.slane %v3741_v21, 5  ;;  %v3829_v35 = vsel %vm3758_vm6, %v506_v18, %v507_v31  ;;  %v130_v21 = vsel %vm3647_vm2, %v125_v4, %v3752_v32  ;;  %v709_v32 = vrot.slane %v707_v39, 6 }
  0x23   :  { %409 = vmatpush1.bf16.msra.mxu0 %v3449_v20  ;;  %291 = vmatprep.mubr.bf16.mxu0 %v3544_v2  ;;  %v716_v20 = vrot.slane %v3651_v30, 4  ;;  %v2452_v57 = vcombine.low %v130_v21, %v140_v40  ;;  %v724_v31 = vor.u32 %v723_v56, %v722_v53  ;;  %v745_v4 = vrot.slane %v111_v55, 5 }
  0x24   :  { %410 = vmatprep.subr.bf16.mxu0 %v3454_v27  ;;  %v2505_v27 = vcombine.low %v3815_v23, %v3819_v24  ;;  %v3833_v38 = vsel %vm3758_vm6, %v509_v19, %v510_v25  ;;  %v730_v14 = vrot.slane %v728_v60, 5  ;;  %v742_v19 = vrot.slane %v740_v62, 6  ;;  %v956_v60 = vld [vmem:[%s5022_s0 + $0x14] sm:$0xc] }
  0x25   :  { %v2506_v36 = vcombine.low %v3829_v35, %v3833_v38  ;;  %v720_v45 = vsel %vm3847_vm9, %v716_v20, %v3687_v52  ;;  %v731_v52 = vshll.u32 %v3864_v51, 16  ;;  %v3878_v33 = vsel %vm3847_vm9, %v721_v47, %v724_v31 }
  0x26   :  { %v726_v16 = vrot.slane %v724_v31, 4  ;;  %v747_v20 = vor.u32 %v746_v34, %v745_v4  ;;  %v756_v21 = vrot.slane %v127_v11, 6  ;;  %v3462_v11 = vld [vmem:[%s5023_s1 + $0xc0] ss:$8 sps:$4 sm:$0xff]   ;;  %v966_v62 = vrot.slane %v3619_v9, 6 }
  0x27   :  { %411 = vmatpush1.bf16.msra.mxu0 %v3452_v58  ;;  %v710_v58 = vor.u32 %v709_v32, %v706_v43 }
  0x28   :  { %412 = vmatprep.subr.bf16.mxu0 %v3457_v61  ;;  %v737_v61 = vshrl.u32 %v478_v1, 16  ;;  %v749_v39 = vrot.slane %v747_v20, 4 }
  0x29   :  { %v711_v13 = vrot.slane %v710_v58, 4 }
  0x2a   :  { %2467 = vmatmul.mubr.msk.bf16.gmra.mrb[8].mxu0 %vm226_vm3, %v2451_v15  ;;  %v733_v15 = vrot.slane %v731_v52, 6  ;;  %v739_v18 = vrot.slane %v737_v61, 5 }
  0x2b   :  { %301 = vmatprep.mubr.bf16.mxu0 %v3544_v2  ;;  %413 = vmatpush1.bf16.msra.mxu0 %v3455_v22  ;;  %v715_v1 = vsel %vm3847_vm9, %v711_v13, %v3651_v30  ;;  %v750_v22 = vrot.slane %v121_v6, 5  ;;  %v755_v30 = vrot.slane %v131_v12, 5  ;;  %v955_v12 = vld [vmem:[%s5022_s0] sm:$0xc] }
  0x2c   :  { %414 = vmatprep.subr.bf16.mxu0 %v3460_v26  ;;  %v734_v55 = vor.u32 %v733_v15, %v730_v14  ;;  %v3886_v54 = vcombine.low %v715_v1, %v720_v45  ;;  %v743_v25 = vor.u32 %v742_v19, %v739_v18  ;;  %v751_v26 = vrot.slane %v117_v17, 6 }
  0x2d   :  { %v761_v17 = vshrl.u32 %v3893_v37, 16  ;;  %v757_v32 = vor.u32 %v756_v21, %v755_v30  ;;  %v2555_v61 = vrot.slane %v955_v12, 10 }
  0x2e   :  { %v3900_v6 = vsel %vm3847_vm9, %v726_v16, %v734_v55  ;;  %v752_v43 = vor.u32 %v751_v26, %v750_v22 }
  0x2f   :  { %415 = vmatpush1.bf16.msra.mxu0 %v3458_v41  ;;  %v2536_v40 = vcombine.low %v3878_v33, %v3900_v6  ;;  %v744_v41 = vrot.slane %v743_v25, 4  ;;  %v763_v45 = vrot.slane %v761_v17, 5  ;;  %v759_v31 = vrot.slane %v757_v32, 4 }
  0x30   :  { %609 = vmatprep.subr.bf16.mxu0 %v3464_v29  ;;  %v764_v29 = vshll.u32 %v3893_v37, 16  ;;  %v753_v53 = vsel %vm3847_vm9, %v749_v39, %v752_v43  ;;  %v754_v56 = vrot.slane %v752_v43, 4 }
  0x31   :  { %v748_v47 = vsel %vm3847_vm9, %v744_v41, %v747_v20 }
  0x32   :  { %2468 = vmatmul.mubr.msk.bf16.gmra.mrb[12].mxu0 %vm226_vm3, %v2452_v57  ;;  %v766_v57 = vrot.slane %v764_v29, 6  ;;  %v3925_v52 = vcombine.low %v748_v47, %v753_v53 }
  0x33   :  { %436 = vmatprep.mubr.bf16.mxu0 %v3544_v2 }
  0x34   :  { %12 = vsyncpa [#allocation6], 0  ;;  %v3467_v4 = vld [vmem:[%s5023_s1 + $0xd4] ss:$8 sps:$4 sm:$0xff]   ;;  %v3933_v13 = vsel %vm3847_vm9, %v754_v56, %v757_v32  ;;  %v767_v14 = vor.u32 %v766_v57, %v763_v45  ;;  %v969_v15 = vrot.slane %v3624_v10, 6  ;;  %v972_v34 = vrot.slane %v3643_v28, 6 }
  0x35   :  { %v3939_v16 = vsel %vm3918_vm12, %v2555_v61, %v966_v62  ;;  %v968_v18 = vrot.slane %v966_v62, 4  ;;  %v975_v19 = vrot.slane %v3864_v51, 6  ;;  %v2556_v1 = vrot.slane %v956_v60, 10  ;;  %v3465_v26 = vld [vmem:[%s5023_s1 + $0xd0] ss:$8 sps:$4 sm:$0xff]   ;;  %s3548_s19 = smov [#allocation5]  }
  0x36   :  { %v3948_v55 = vsel %vm3847_vm9, %v759_v31, %v767_v14  ;;  %v971_v20 = vrot.slane %v969_v15, 4  ;;  %v974_v22 = vrot.slane %v972_v34, 4  ;;  %v979_v25 = vrot.slane %v3679_v46, 6  ;;  %v3471_v51 = vld [vmem:[%s5023_s1 + $0xe4] ss:$8 sps:$4 sm:$0xff]   ;;  %s2429_s20 = sshll.u32 %s3548_s19, 4  ;;  %s2430_s20 = int_to_ptr.vmem [resolvable:$true] %s2429_s20 }
  0x37   :  { %v2538_v8 = vcombine.low %v3933_v13, %v3948_v55  ;;  %v3959_v9 = vsel %vm3918_vm12, %v968_v18, %v969_v15  ;;  %v982_v44 = vrot.slane %v3715_v5, 6  ;;  %v2470_v32 = vcombine.low %v3624_v10, %v3643_v28  ;;  %v3475_v10 = vld [vmem:[%s5023_s1 + $0xf4] ss:$8 sps:$4 sm:$0xff]   ;;  %v3473_v57 = vld [vmem:[%s5023_s1 + $0xf0] ss:$8 sps:$4 sm:$0xff]   ;;  %v2595_v55 = vld [vmem:[%s5025_s3 + $0x128] sm:$0xff]  ;;  %p3525_p1 = scmp.lt.s32.totalorder %s2430_s20, %s2430_s20 }
  0x38   :  { %v2569_v30 = vcombine.low %v3939_v16, %v3959_v9  ;;  %v3970_v39 = vsel %vm3918_vm12, %v971_v20, %v972_v34  ;;  %v3974_v21 = vsel %vm3918_vm12, %v974_v22, %v975_v19  ;;  %v3978_v17 = vsel %vm3918_vm12, %v2556_v1, %v979_v25  ;;  %v3478_v60 = vld [vmem:[%s5023_s1 + $0x104] ss:$8 sps:$4 sm:$0xff]   ;;  %v3476_v31 = vld [vmem:[%s5023_s1 + $0x100] ss:$8 sps:$4 sm:$0xff]   ;;  %v3482_v61 = vld [vmem:[%s5023_s1 + $0x114] ss:$8 sps:$4 sm:$0xff]  }
  0x39   :  { %v2570_v41 = vcombine.low %v3970_v39, %v3974_v21  ;;  %v981_v43 = vrot.slane %v979_v25, 4  ;;  %v984_v29 = vrot.slane %v982_v44, 4  ;;  %v988_v45 = vrot.slane %v3893_v37, 6  ;;  %v3480_v62 = vld [vmem:[%s5023_s1 + $0x110] ss:$8 sps:$4 sm:$0xff]   ;;  %v2590_v16 = vld [vmem:[%s5025_s3 + $0x100] sm:$0xff] }
  0x3a   :  { %2485 = vmatmul.mubr.msk.bf16.vlgmr.msra.gmra.mrb[0].mxu0 %vm226_vm3, %v2469_v50  ;;  %v985_v50 = vrot.slane %v3707_v3, 6  ;;  %v2471_v58 = vcombine.low %v3671_v42, %v3679_v46  ;;  %v3485_v42 = vld [vmem:[%s5023_s1 + $0x124] ss:$8 sps:$4 sm:$0xff]   ;;  %v2472_v46 = vcombine.low %v3715_v5, %v3707_v3  ;;  %v3488_v14 = vld [vmem:[%s5023_s1 + $0x134] ss:$8 sps:$4 sm:$0xff]   ;;  %vm3547_vm13 = vmmov 0  }
  0x3b   :  { %610 = vmatpush1.bf16.msra.mxu0 %v3462_v11  ;;  %446 = vmatprep.mubr.bf16.mxu0 %v3544_v2  ;;  %v3469_v11 = vld [vmem:[%s5023_s1 + $0xe0] ss:$8 sps:$4 sm:$0xff]   ;;  %v3990_v47 = vsel %vm3918_vm12, %v981_v43, %v982_v44  ;;  %v3486_v3 = vld [vmem:[%s5023_s1 + $0x130] ss:$8 sps:$4 sm:$0xff]   ;;  %v3491_v5 = vld [vmem:[%s5023_s1 + $0x144] ss:$8 sps:$4 sm:$0xff]  }
  0x3c   :  { %611 = vmatprep.subr.bf16.mxu0 %v3467_v4  ;;  %v987_v12 = vrot.slane %v985_v50, 4  ;;  %v3994_v53 = vsel %vm3918_vm12, %v984_v29, %v985_v50  ;;  %v2571_v28 = vcombine.low %v3978_v17, %v3990_v47  ;;  %v3483_v4 = vld [vmem:[%s5023_s1 + $0x120] ss:$8 sps:$4 sm:$0xff]   ;;  %v3494_v48 = vld [vmem:[%s5023_s1 + $0x154] ss:$8 sps:$4 sm:$0xff]   ;;  %vm1956_vm14 = vcmask 1041409  }
  0x3d   :  { %v3489_v15 = vld [vmem:[%s5023_s1 + $0x140] ss:$8 sps:$4 sm:$0xff]   ;;  %v3492_v59 = vld [vmem:[%s5023_s1 + $0x150] ss:$8 sps:$4 sm:$0xff]   ;;  %v3500_v49 = vld [vmem:[%s5023_s1 + $0x174] ss:$8 sps:$4 sm:$0xff]  }
  0x3e   :  { %v4003_v37 = vsel %vm3918_vm12, %v987_v12, %v988_v45  ;;  %v3495_v34 = vld [vmem:[%s5023_s1 + $0x160] ss:$8 sps:$4 sm:$0xff]   ;;  %v3498_v0 = vld [vmem:[%s5023_s1 + $0x170] ss:$8 sps:$4 sm:$0xff]   ;;  %v3506_v24 = vld [vmem:[%s5023_s1 + $0x194] ss:$8 sps:$4 sm:$0xff]  }
  0x3f   :  { %612 = vmatpush1.bf16.msra.mxu0 %v3465_v26  ;;  %v2572_v56 = vcombine.low %v3994_v53, %v4003_v37  ;;  %v3501_v23 = vld [vmem:[%s5023_s1 + $0x180] ss:$8 sps:$4 sm:$0xff]   ;;  %v3509_v35 = vld [vmem:[%s5023_s1 + $0x1a4] ss:$8 sps:$4 sm:$0xff]   ;;  %v3518_v33 = vld [vmem:[%s5023_s1 + $0x1d4] ss:$8 sps:$4 sm:$0xff]  }
  0x40   :  { %613 = vmatprep.subr.bf16.mxu0 %v3471_v51  ;;  %v3507_v38 = vld [vmem:[%s5023_s1 + $0x1a0] ss:$8 sps:$4 sm:$0xff]   ;;  %v3515_v18 = vld [vmem:[%s5023_s1 + $0x1c4] ss:$8 sps:$4 sm:$0xff]   ;;  %v3516_v6 = vld [vmem:[%s5023_s1 + $0x1d0] ss:$8 sps:$4 sm:$0xff]  }
  0x41   :  { %v3513_v19 = vld [vmem:[%s5023_s1 + $0x1c0] ss:$8 sps:$4 sm:$0xff]   ;;  %v2597_v20 = vld [vmem:[%s5025_s3 + $0x138] sm:$0xff]  ;;  %v2596_v26 = vld [vmem:[%s5025_s3 + $0x130] sm:$0xff]  ;;  %s3520_s21 = scalar_lea.vmem %s2430_s20, 32 }
  0x42   :  { %2486 = vmatmul.mubr.msk.bf16.gmra.mrb[4].mxu0 %vm226_vm3, %v2470_v32  ;;  %v3048_v22 = vpack.c.bf16 %v2597_v20, %v2595_v55  ;;  %v2594_v25 = vld [vmem:[%s5025_s3 + $0x120] sm:$0xff]  ;;  %v2599_v9 = vld [vmem:[%s5025_s3 + $0x148] sm:$0xff]  ;;  %v2601_v44 = vld [vmem:[%s5025_s3 + $0x158] sm:$0xff]  ;;  %p3521_p0 = scmp.ne.s32.totalorder %s2430_s20, %s3520_s21  ;;  %p3526_p2 = scmp.lt.s32.totalorder %s3520_s21, %s3520_s21 }
  0x43   :  { %614 = vmatpush1.bf16.msra.mxu0 %v3469_v11  ;;  %456 = vmatprep.mubr.bf16.mxu0 %v3544_v2  ;;  %v3052_v50 = vpack.c.bf16 %v2601_v44, %v2599_v9  ;;  %v2598_v51 = vld [vmem:[%s5025_s3 + $0x140] sm:$0xff]  ;;  %v2603_v21 = vld [vmem:[%s5025_s3 + $0x168] sm:$0xff]  ;;  %v2605_v17 = vld [vmem:[%s5025_s3 + $0x178] sm:$0xff] }
  0x44   :  { %615 = vmatprep.subr.bf16.mxu0 %v3475_v10  ;;  %v2602_v43 = vld [vmem:[%s5025_s3 + $0x160] sm:$0xff]  ;;  %v2604_v29 = vld [vmem:[%s5025_s3 + $0x170] sm:$0xff]  ;;  %v2607_v32 = vld [vmem:[%s5025_s3 + $0x188] sm:$0xff]  ;;  %p3527_p3 = por %p3526_p2, %p3525_p1 }
  0x45   :  { %v3058_v12 = vpack.c.bf16 %v2604_v29, %v2602_v43  ;;  %v2609_v45 = vld [vmem:[%s5025_s3 + $0x198] sm:$0xff]  ;;  %v2606_v47 = vld [vmem:[%s5025_s3 + $0x180] sm:$0xff]  ;;  %v2608_v53 = vld [vmem:[%s5025_s3 + $0x190] sm:$0xff] }
  0x46   :  { %v3060_v11 = vpack.c.bf16 %v2609_v45, %v2607_v32  ;;  %v3062_v10 = vpack.c.bf16 %v2608_v53, %v2606_v47  ;;  %v2613_v37 = vld [vmem:[%s5025_s3 + $0x1b8] sm:$0xff]  ;;  %v1238_v47 = vld [vmem:[%s5025_s3 + $0x10] sm:$0xff]  ;;  %v1241_v53 = vld [vmem:[%s5025_s3 + $0x28] sm:$0xff]  ;;  %p3528_p4 = pnand %p3527_p3, %p3521_p0 }
  0x47   :  { %616 = vmatpush1.bf16.msra.mxu0 %v3473_v57  ;;  %v2610_v57 = vld [vmem:[%s5025_s3 + $0x1a0] sm:$0xff] }
  0x48   :  { %617 = vmatprep.subr.bf16.mxu0 %v3478_v60  ;;  %v2612_v60 = vld [vmem:[%s5025_s3 + $0x1b0] sm:$0xff] }
  0x4a   :  { %2487 = vmatmul.mubr.msk.bf16.gmra.mrb[8].mxu0 %vm226_vm3, %v2471_v58  ;;  %v3066_v58 = vpack.c.bf16 %v2612_v60, %v2610_v57  ;;  %v1240_v57 = vld [vmem:[%s5025_s3 + $0x20] sm:$0xff]  ;;  %v1242_v60 = vld [vmem:[%s5025_s3 + $0x30] sm:$0xff] }
  0x4b   :  { %466 = vmatprep.mubr.bf16.mxu0 %v3544_v2  ;;  %618 = vmatpush1.bf16.msra.mxu0 %v3476_v31  ;;  %v2615_v31 = vld [vmem:[%s5025_s3 + $0x1c8] sm:$0xff] }
  0x4c   :  { %619 = vmatprep.subr.bf16.mxu0 %v3482_v61  ;;  %v2617_v61 = vld [vmem:[%s5025_s3 + $0x1d8] sm:$0xff] }
  0x4f   :  { %620 = vmatpush1.bf16.msra.mxu0 %v3480_v62  ;;  %v3068_v62 = vpack.c.bf16 %v2617_v61, %v2615_v31  ;;  %v1245_v61 = vld [vmem:[%s5025_s3 + $0x48] sm:$0xff] }
  0x50   :  { %866 = vmatprep.subr.bf16.mxu0 %v3485_v42  ;;  %v2614_v42 = vld [vmem:[%s5025_s3 + $0x1c0] sm:$0xff] }
  0x52   :  { %2488 = vmatmul.mubr.msk.bf16.gmra.mrb[12].mxu0 %vm226_vm3, %v2472_v46  ;;  %v2616_v46 = vld [vmem:[%s5025_s3 + $0x1d0] sm:$0xff] }
  0x53   :  { %641 = vmatprep.mubr.bf16.mxu0 %v3544_v2 }
  0x5a   :  { %2519 = vmatmul.mubr.msk.bf16.vlgmr.msra.gmra.mrb[0].mxu0 %vm226_vm3, %v2503_v63  ;;  %v3497_v63 = vld [vmem:[%s5023_s1 + $0x164] ss:$8 sps:$4 sm:$0xff]  }
  0x5b   :  { %867 = vmatpush1.bf16.msra.mxu0 %v3483_v4  ;;  %651 = vmatprep.mubr.bf16.mxu0 %v3544_v2  ;;  %v3070_v4 = vpack.c.bf16 %v2616_v46, %v2614_v42 }
  0x5c   :  { %868 = vmatprep.subr.bf16.mxu0 %v3488_v14  ;;  %v2619_v14 = vld [vmem:[%s5025_s3 + $0x1e8] sm:$0xff] }
  0x5f   :  { %869 = vmatpush1.bf16.msra.mxu0 %v3486_v3  ;;  %v2621_v3 = vld [vmem:[%s5025_s3 + $0x1f8] sm:$0xff] }
  0x60   :  { %870 = vmatprep.subr.bf16.mxu0 %v3491_v5  ;;  %v3545_v5 = vmov 0.0  }
  0x61   :  { %1369 = vmatprep.mubr.f32.mxu1 %v3545_v5  ;;  %1230 = vst [vmem:[#allocation3 + $0x10] sm:$0xff] %v3545_v5  ;;  %1231 = vst [vmem:[#allocation3 + $0x28] sm:$0xff] %v3545_v5 }
  0x62   :  { %2520 = vmatmul.mubr.msk.bf16.gmra.mrb[4].mxu0 %vm226_vm3, %v2504_v7  ;;  %v3503_v7 = vld [vmem:[%s5023_s1 + $0x184] ss:$8 sps:$4 sm:$0xff]  }
  0x63   :  { %871 = vmatpush1.bf16.msra.mxu0 %v3489_v15  ;;  %661 = vmatprep.mubr.bf16.mxu0 %v3544_v2  ;;  %v3072_v15 = vpack.c.bf16 %v2621_v3, %v2619_v14 }
  0x64   :  { %872 = vmatprep.subr.bf16.mxu0 %v3494_v48  ;;  %v2618_v48 = vld [vmem:[%s5025_s3 + $0x1e0] sm:$0xff] }
  0x67   :  { %873 = vmatpush1.bf16.msra.mxu0 %v3492_v59  ;;  %v2620_v59 = vld [vmem:[%s5025_s3 + $0x1f0] sm:$0xff] }
  0x68   :  { %874 = vmatprep.subr.bf16.mxu0 %v3497_v63  ;;  %v3074_v63 = vpack.c.bf16 %v2620_v59, %v2618_v48  ;;  %v1246_v48 = vld [vmem:[%s5025_s3 + $0x50] sm:$0xff] }
  0x6a   :  { %2521 = vmatmul.mubr.msk.bf16.gmra.mrb[8].mxu0 %vm226_vm3, %v2505_v27  ;;  %v3504_v27 = vld [vmem:[%s5023_s1 + $0x190] ss:$8 sps:$4 sm:$0xff]  }
  0x6b   :  { %671 = vmatprep.mubr.bf16.mxu0 %v3544_v2  ;;  %875 = vmatpush1.bf16.msra.mxu0 %v3495_v34  ;;  %v1237_v34 = vld [vmem:[%s5025_s3 + $0x8] sm:$0xff] }
  0x6c   :  { %876 = vmatprep.subr.bf16.mxu0 %v3500_v49  ;;  %v1239_v49 = vld [vmem:[%s5025_s3 + $0x18] sm:$0xff] }
  0x6f   :  { %877 = vmatpush1.bf16.msra.mxu0 %v3498_v0  ;;  %v3076_v0 = vpack.c.bf16 %v1239_v49, %v1237_v34  ;;  %v1251_v34 = vld [vmem:[%s5025_s3 + $0x78] sm:$0xff] }
  0x70   :  { %1087 = vmatprep.subr.bf16.mxu0 %v3503_v7 }
  0x72   :  { %2522 = vmatmul.mubr.msk.bf16.gmra.mrb[12].mxu0 %vm226_vm3, %v2506_v36  ;;  %v3512_v36 = vld [vmem:[%s5023_s1 + $0x1b4] ss:$8 sps:$4 sm:$0xff]  }
  0x73   :  { %898 = vmatprep.mubr.bf16.mxu0 %v3544_v2 }
  0x7a   :  { %2551 = vmatmul.mubr.msk.bf16.vlgmr.msra.gmra.mrb[0].mxu0 %vm226_vm3, %v3886_v54  ;;  %v3510_v54 = vld [vmem:[%s5023_s1 + $0x1b0] ss:$8 sps:$4 sm:$0xff]  }
  0x7b   :  { %1088 = vmatpush1.bf16.msra.mxu0 %v3501_v23  ;;  %908 = vmatprep.mubr.bf16.mxu0 %v3544_v2 }
  0x7c   :  { %1089 = vmatprep.subr.bf16.mxu0 %v3506_v24 }
  0x7f   :  { %1090 = vmatpush1.bf16.msra.mxu0 %v3504_v27 }
  0x80   :  { %1091 = vmatprep.subr.bf16.mxu0 %v3509_v35 }
  0x82   :  { %2552 = vmatmul.mubr.msk.bf16.gmra.mrb[4].mxu0 %vm226_vm3, %v2536_v40  ;;  %v2591_v40 = vld [vmem:[%s5025_s3 + $0x108] sm:$0xff] }
  0x83   :  { %1092 = vmatpush1.bf16.msra.mxu0 %v3507_v38  ;;  %918 = vmatprep.mubr.bf16.mxu0 %v3544_v2 }
  0x84   :  { %1093 = vmatprep.subr.bf16.mxu0 %v3512_v36 }
  0x87   :  { %1094 = vmatpush1.bf16.msra.mxu0 %v3510_v54 }
  0x88   :  { %1095 = vmatprep.subr.bf16.mxu0 %v3515_v18 }
  0x8a   :  { %2553 = vmatmul.mubr.msk.bf16.gmra.mrb[8].mxu0 %vm226_vm3, %v3925_v52  ;;  %v2593_v52 = vld [vmem:[%s5025_s3 + $0x118] sm:$0xff] }
  0x8b   :  { %928 = vmatprep.mubr.bf16.mxu0 %v3544_v2  ;;  %1096 = vmatpush1.bf16.msra.mxu0 %v3513_v19  ;;  %v3044_v13 = vpack.c.bf16 %v2593_v52, %v2591_v40 }
  0x8c   :  { %1097 = vmatprep.subr.bf16.mxu0 %v3518_v33 }
  0x8d   :  { %3045 = vmatprep.subr.bf16.mxu1 %v3044_v13  ;;  %v2589_v13 = vld [vmem:[%s5024_s2] ss:$0 sm:$0xff] }
  0x8f   :  { %1098 = vmatpush1.bf16.msra.mxu0 %v3516_v6 }
  0x92   :  { %2554 = vmatmul.mubr.msk.bf16.gmra.mrb[12].mxu0 %vm226_vm3, %v2538_v8  ;;  %v3050_v8 = vpack.c.bf16 %v2596_v26, %v2594_v25 }
  0x93   :  { %1119 = vmatprep.mubr.bf16.mxu0 %v3544_v2 }
  0x9a   :  { %2585 = vmatmul.mubr.msk.bf16.vlgmr.msra.gmra.mrb[0].mxu0 %vm226_vm3, %v2569_v30  ;;  %v2600_v30 = vld [vmem:[%s5025_s3 + $0x150] sm:$0xff] }
  0x9b   :  { %1129 = vmatprep.mubr.bf16.mxu0 %v3544_v2  ;;  %v3054_v39 = vpack.c.bf16 %v2600_v30, %v2598_v51 }
  0xa2   :  { %2586 = vmatmul.mubr.msk.bf16.gmra.mrb[4].mxu0 %vm226_vm3, %v2570_v41  ;;  %v3056_v41 = vpack.c.bf16 %v2605_v17, %v2603_v21 }
  0xa3   :  { %1139 = vmatprep.mubr.bf16.mxu0 %v3544_v2 }
  0xaa   :  { %2587 = vmatmul.mubr.msk.bf16.gmra.mrb[8].mxu0 %vm226_vm3, %v2571_v28  ;;  %v2611_v28 = vld [vmem:[%s5025_s3 + $0x1a8] sm:$0xff] }
  0xab   :  { %1149 = vmatprep.mubr.bf16.mxu0 %v3544_v2  ;;  %v2592_v2 = vld [vmem:[%s5025_s3 + $0x110] sm:$0xff] }
  0xac   :  { %v3046_v1 = vpack.c.bf16 %v2592_v2, %v2590_v16 }
  0xae   :  { %3047 = vmatpush1.bf16.msra.mxu1 %v3046_v1 }
  0xaf   :  { %3049 = vmatprep.subr.bf16.mxu1 %v3048_v22 }
  0xb2   :  { %2588 = vmatmul.mubr.msk.bf16.gmra.mrb[12].mxu0 %vm226_vm3, %v2572_v56  ;;  %3051 = vmatpush1.bf16.msra.mxu1 %v3050_v8  ;;  %v3064_v56 = vpack.c.bf16 %v2613_v37, %v2611_v28 }
  0xb3   :  { %3053 = vmatprep.subr.bf16.mxu1 %v3052_v50  ;;  %2901 = vmatprep.mubr.msk.f32.mxu0 %vm3547_vm13, %v3545_v5 }
  0xb6   :  { %3055 = vmatpush1.bf16.msra.mxu1 %v3054_v39 }
  0xb7   :  { %3057 = vmatprep.subr.bf16.mxu1 %v3056_v41 }
  0xba   :  { %3059 = vmatpush1.bf16.msra.mxu1 %v3058_v12 }
  0xbb   :  { %3061 = vmatprep.subr.bf16.mxu1 %v3060_v11  ;;  %v1236_v11 = vld [vmem:[%s5025_s3] sm:$0xff] }
  0xbc   :  { %v3078_v37 = vpack.c.bf16 %v1238_v47, %v1236_v11  ;;  %v2623_v11 = vld [vmem:[%s5025_s3 + $0x208] sm:$0xff]  ;;  %v2625_v47 = vld [vmem:[%s5025_s3 + $0x218] sm:$0xff] }
  0xbe   :  { %3063 = vmatpush1.bf16.msra.mxu1 %v3062_v10  ;;  %v1243_v10 = vld [vmem:[%s5025_s3 + $0x38] sm:$0xff] }
  0xbf   :  { %3065 = vmatprep.subr.bf16.mxu1 %v3064_v56  ;;  %v3080_v56 = vpack.c.bf16 %v1243_v10, %v1241_v53  ;;  %v3108_v10 = vpack.c.bf16 %v2625_v47, %v2623_v11  ;;  %v2665_v11 = vld [vmem:[%s5025_s3 + $0x358] sm:$0xff] }
  0xc2   :  { %3067 = vmatpush1.bf16.msra.mxu1 %v3066_v58 }
  0xc3   :  { %3069 = vmatprep.subr.bf16.mxu1 %v3068_v62  ;;  %v1247_v62 = vld [vmem:[%s5025_s3 + $0x58] sm:$0xff] }
  0xc4   :  { %v3084_v3 = vpack.c.bf16 %v1247_v62, %v1245_v61  ;;  %v2626_v62 = vld [vmem:[%s5025_s3 + $0x220] sm:$0xff] }
  0xc6   :  { %3071 = vmatpush1.bf16.msra.mxu1 %v3070_v4  ;;  %v3082_v4 = vpack.c.bf16 %v1242_v60, %v1240_v57  ;;  %v2627_v57 = vld [vmem:[%s5025_s3 + $0x228] sm:$0xff]  ;;  %v2629_v60 = vld [vmem:[%s5025_s3 + $0x238] sm:$0xff] }
  0xc7   :  { %3073 = vmatprep.subr.bf16.mxu1 %v3072_v15  ;;  %v1244_v15 = vld [vmem:[%s5025_s3 + $0x40] sm:$0xff]  ;;  %v3112_v61 = vpack.c.bf16 %v2629_v60, %v2627_v57  ;;  %v2667_v57 = vld [vmem:[%s5025_s3 + $0x368] sm:$0xff]  ;;  %v2669_v60 = vld [vmem:[%s5025_s3 + $0x378] sm:$0xff] }
  0xca   :  { %3075 = vmatpush1.bf16.msra.mxu1 %v3074_v63  ;;  %v1249_v63 = vld [vmem:[%s5025_s3 + $0x68] sm:$0xff] }
  0xcb   :  { %3077 = vmatprep.subr.bf16.mxu1 %v3076_v0  ;;  %v3086_v0 = vpack.c.bf16 %v1246_v48, %v1244_v15  ;;  %v2630_v15 = vld [vmem:[%s5025_s3 + $0x240] sm:$0xff]  ;;  %v2632_v48 = vld [vmem:[%s5025_s3 + $0x250] sm:$0xff] }
 0x16d   :  { %v1121_v7 = vpop.f32.mrb[0].mxu0 }
 0x16e   :  { %v1123_v23 = vpop.f32.mrb[1].mxu0 }
 0x16f   :  { %v1176_v24 = vmax.f32 %v1121_v7, %v1123_v23  ;;  %v1125_v27 = vpop.f32.mrb[2].mxu0  ;;  %v3088_v7 = vpack.c.bf16 %v1251_v34, %v1249_v63  ;;  %v1248_v23 = vld [vmem:[%s5025_s3 + $0x60] sm:$0xff] }
 0x170   :  { %v1127_v35 = vpop.f32.mrb[3].mxu0  ;;  %v2634_v34 = vld [vmem:[%s5025_s3 + $0x260] sm:$0xff] }
 0x171   :  { %1184 = vst [vmem:[#allocation2] sm:$0xff] %v1176_v24  ;;  %v1177_v38 = vmax.f32 %v1125_v27, %v1127_v35  ;;  %v1250_v24 = vld [vmem:[%s5025_s3 + $0x70] sm:$0xff]  ;;  %v1253_v35 = vld [vmem:[%s5025_s3 + $0x88] sm:$0xff] }
 0x173   :  { %1185 = vst [vmem:[#allocation2 + $0x8] sm:$0xff] %v1177_v38  ;;  %v1255_v38 = vld [vmem:[%s5025_s3 + $0x98] sm:$0xff] }
 0x175   :  { %v1131_v36 = vpop.f32.mrb[4].mxu0 }
 0x176   :  { %v1133_v54 = vpop.f32.mrb[5].mxu0 }
 0x177   :  { %v1178_v18 = vmax.f32 %v1131_v36, %v1133_v54  ;;  %v1135_v19 = vpop.f32.mrb[6].mxu0  ;;  %v3090_v36 = vpack.c.bf16 %v1250_v24, %v1248_v23  ;;  %v3092_v54 = vpack.c.bf16 %v1255_v38, %v1253_v35  ;;  %v2638_v24 = vld [vmem:[%s5025_s3 + $0x280] sm:$0xff]  ;;  %v2640_v35 = vld [vmem:[%s5025_s3 + $0x290] sm:$0xff]  ;;  %v2643_v38 = vld [vmem:[%s5025_s3 + $0x2a8] sm:$0xff] }
 0x178   :  { %v1137_v33 = vpop.f32.mrb[7].mxu0 }
 0x179   :  { %1186 = vst [vmem:[#allocation2 + $0x10] sm:$0xff] %v1178_v18  ;;  %v1179_v6 = vmax.f32 %v1135_v19, %v1137_v33  ;;  %v1252_v18 = vld [vmem:[%s5025_s3 + $0x80] sm:$0xff]  ;;  %v1254_v19 = vld [vmem:[%s5025_s3 + $0x90] sm:$0xff]  ;;  %v1257_v33 = vld [vmem:[%s5025_s3 + $0xa8] sm:$0xff] }
 0x17a   :  { %v1192_v40 = vld [vmem:[#allocation2] ss:$2 sm:$0xff]  ;;  %v1200_v52 = vld [vmem:[#allocation2 + $0x1] ss:$2 sm:$0xff] }
 0x17b   :  { %v1207_v16 = vmax.f32 %v1192_v40, %v1200_v52  ;;  %1187 = vst [vmem:[#allocation2 + $0x18] sm:$0xff] %v1179_v6  ;;  %v1259_v6 = vld [vmem:[%s5025_s3 + $0xb8] sm:$0xff]  ;;  %v2719_v40 = vld [vmem:[%s5027_s5 + $0x80] sm:$0xff]  ;;  %v2720_v52 = vld [vmem:[%s5027_s5 + $0x88] sm:$0xff] }
 0x17d   :  { %v1141_v2 = vpop.f32.mrb[8].mxu0  ;;  %v4267_v1 = vadd.f32 %v2589_v13, %v1207_v16  ;;  %v3546_v16 = vmov 0.0|0.0  }
 0x17e   :  { %v1143_v55 = vpop.f32.mrb[9].mxu0  ;;  %3204 = vmatprep.subr.bf16.mxu0 %v3546_v16 }
 0x17f   :  { %v1180_v20 = vmax.f32 %v1141_v2, %v1143_v55  ;;  %v1145_v22 = vpop.f32.mrb[10].mxu0  ;;  %v1222_v25 = vmax.f32 %v4267_v1, 0.0  ;;  %v3205_v2 = vpack.c.bf16 %v2720_v52, %v2719_v40  ;;  %v3096_v55 = vpack.c.bf16 %v1259_v6, %v1257_v33  ;;  %v2637_v1 = vld [vmem:[%s5025_s3 + $0x278] sm:$0xff]  ;;  %v2646_v6 = vld [vmem:[%s5025_s3 + $0x2c0] sm:$0xff]  ;;  %v2648_v40 = vld [vmem:[%s5025_s3 + $0x2d0] sm:$0xff] }
 0x180   :  { %v1147_v26 = vpop.f32.mrb[11].mxu0  ;;  %v2651_v52 = vld [vmem:[%s5025_s3 + $0x2e8] sm:$0xff] }
 0x181   :  { %1188 = vst [vmem:[#allocation2 + $0x20] sm:$0xff] %v1180_v20  ;;  %v1181_v8 = vmax.f32 %v1145_v22, %v1147_v26  ;;  %1226 = vst [vmem:[#allocation3] sm:$0xff] %v1222_v25  ;;  %v1256_v20 = vld [vmem:[%s5025_s3 + $0xa0] sm:$0xff]  ;;  %v1258_v22 = vld [vmem:[%s5025_s3 + $0xb0] sm:$0xff]  ;;  %3206 = vmatpush3.bf16.msra.mxu0 %v3205_v2  ;;  %v3134_v2 = vpack.c.bf16 %v2648_v40, %v2646_v6 }
 0x182   :  { %v1194_v9 = vld [vmem:[#allocation2 + $0x10] ss:$2 sm:$0xff]  ;;  %v1202_v44 = vld [vmem:[#allocation2 + $0x11] ss:$2 sm:$0xff]  ;;  %3207 = vmatprep.subr.bf16.mxu0 %v3546_v16 }
 0x183   :  { %v1208_v50 = vmax.f32 %v1194_v9, %v1202_v44  ;;  %1189 = vst [vmem:[#allocation2 + $0x28] sm:$0xff] %v1181_v8  ;;  %v1261_v8 = vld [vmem:[%s5025_s3 + $0xc8] sm:$0xff]  ;;  %v1263_v9 = vld [vmem:[%s5025_s3 + $0xd8] sm:$0xff]  ;;  %v3098_v44 = vpack.c.bf16 %v1258_v22, %v1256_v20  ;;  %v2650_v20 = vld [vmem:[%s5025_s3 + $0x2e0] sm:$0xff] }
 0x184   :  { %v2652_v22 = vld [vmem:[%s5025_s3 + $0x2f0] sm:$0xff] }
 0x185   :  { %v1151_v51 = vpop.f32.mrb[12].mxu0  ;;  %v4272_v30 = vadd.f32 %v2589_v13, %v1208_v50  ;;  %v3100_v50 = vpack.c.bf16 %v1263_v9, %v1261_v8  ;;  %v2657_v8 = vld [vmem:[%s5025_s3 + $0x318] sm:$0xff]  ;;  %v3138_v9 = vpack.c.bf16 %v2652_v22, %v2650_v20 }
 0x186   :  { %v1153_v39 = vpop.f32.mrb[13].mxu0 }
 0x187   :  { %v1182_v21 = vmax.f32 %v1151_v51, %v1153_v39  ;;  %v1155_v17 = vpop.f32.mrb[14].mxu0  ;;  %v1223_v41 = vmax.f32 %v4272_v30, 0.0  ;;  %v1260_v51 = vld [vmem:[%s5025_s3 + $0xc0] sm:$0xff]  ;;  %v1262_v39 = vld [vmem:[%s5025_s3 + $0xd0] sm:$0xff]  ;;  %v2641_v30 = vld [vmem:[%s5025_s3 + $0x298] sm:$0xff] }
 0x188   :  { %v1157_v43 = vpop.f32.mrb[15].mxu0 }
 0x189   :  { %1190 = vst [vmem:[#allocation2 + $0x30] sm:$0xff] %v1182_v21  ;;  %v1183_v29 = vmax.f32 %v1155_v17, %v1157_v43  ;;  %1227 = vst [vmem:[#allocation3 + $0x8] sm:$0xff] %v1223_v41  ;;  %v1265_v17 = vld [vmem:[%s5025_s3 + $0xe8] sm:$0xff]  ;;  %v1267_v43 = vld [vmem:[%s5025_s3 + $0xf8] sm:$0xff] }
 0x18a   :  { %v1196_v12 = vld [vmem:[#allocation2 + $0x20] ss:$2 sm:$0xff]  ;;  %v1204_v32 = vld [vmem:[#allocation2 + $0x21] ss:$2 sm:$0xff] }
 0x18b   :  { %v1209_v45 = vmax.f32 %v1196_v12, %v1204_v32  ;;  %1191 = vst [vmem:[#allocation2 + $0x38] sm:$0xff] %v1183_v29  ;;  %v3102_v29 = vpack.c.bf16 %v1262_v39, %v1260_v51  ;;  %v3104_v12 = vpack.c.bf16 %v1267_v43, %v1265_v17  ;;  %v1264_v32 = vld [vmem:[%s5025_s3 + $0xe0] sm:$0xff]  ;;  %v2656_v51 = vld [vmem:[%s5025_s3 + $0x310] sm:$0xff]  ;;  %v2659_v39 = vld [vmem:[%s5025_s3 + $0x328] sm:$0xff] }
 0x18d   :  { %v4289_v28 = vadd.f32 %v2589_v13, %v1209_v45  ;;  %v1266_v45 = vld [vmem:[%s5025_s3 + $0xf0] sm:$0xff] }
 0x18e   :  { %v3106_v53 = vpack.c.bf16 %v1266_v45, %v1264_v32  ;;  %v2663_v45 = vld [vmem:[%s5025_s3 + $0x348] sm:$0xff] }
 0x18f   :  { %v1224_v58 = vmax.f32 %v4289_v28, 0.0  ;;  %v2645_v28 = vld [vmem:[%s5025_s3 + $0x2b8] sm:$0xff] }
 0x190   :  { %v1268_v31 = vld [vmem:[#allocation3 + $0x1] sm:$0xff]  ;;  %v1269_v59 = vld [vmem:[#allocation3 + $0x9] sm:$0xff] }
 0x191   :  { %1370 = vmatmul.mubr.f32.vlgmr.msra.gmra.mrb[0].mxu1 %v1268_v31  ;;  %1228 = vst [vmem:[#allocation3 + $0x18] sm:$0xff] %v1224_v58  ;;  %v1483_v32 = vld [vmem:[#allocation3 + $0x2] sm:$0xff] }
 0x192   :  { %v1198_v42 = vld [vmem:[#allocation2 + $0x30] ss:$2 sm:$0xff]  ;;  %v1206_v46 = vld [vmem:[#allocation2 + $0x31] ss:$2 sm:$0xff]  ;;  %3079 = vmatpush1.bf16.msra.mxu1 %v3078_v37  ;;  %1375 = vmatprep.mubr.f32.mxu1 %v3545_v5 }
 0x193   :  { %v1210_v14 = vmax.f32 %v1198_v42, %v1206_v46  ;;  %3081 = vmatprep.subr.bf16.mxu1 %v3080_v56  ;;  %v2622_v37 = vld [vmem:[%s5025_s3 + $0x200] sm:$0xff]  ;;  %v2624_v56 = vld [vmem:[%s5025_s3 + $0x210] sm:$0xff]  ;;  %v2631_v46 = vld [vmem:[%s5025_s3 + $0x248] sm:$0xff] }
 0x194   :  { %v3110_v31 = vpack.c.bf16 %v2624_v56, %v2622_v37  ;;  %v2628_v42 = vld [vmem:[%s5025_s3 + $0x230] sm:$0xff] }
 0x195   :  { %1376 = vmatmul.mubr.f32.gmra.mrb[2].mxu1 %v1269_v59  ;;  %v4319_v49 = vadd.f32 %v2589_v13, %v1210_v14  ;;  %v3094_v13 = vpack.c.bf16 %v1254_v19, %v1252_v18  ;;  %v3114_v14 = vpack.c.bf16 %v2628_v42, %v2626_v62  ;;  %v2635_v59 = vld [vmem:[%s5025_s3 + $0x268] sm:$0xff]  ;;  %v2644_v18 = vld [vmem:[%s5025_s3 + $0x2b0] sm:$0xff]  ;;  %v2666_v62 = vld [vmem:[%s5025_s3 + $0x360] sm:$0xff] }
 0x196   :  { %3083 = vmatpush1.bf16.msra.mxu1 %v3082_v4  ;;  %1381 = vmatprep.mubr.f32.mxu1 %v3545_v5  ;;  %v2633_v4 = vld [vmem:[%s5025_s3 + $0x258] sm:$0xff]  ;;  %v3120_v63 = vpack.c.bf16 %v2637_v1, %v2635_v59  ;;  %v2647_v19 = vld [vmem:[%s5025_s3 + $0x2c8] sm:$0xff]  ;;  %v2664_v37 = vld [vmem:[%s5025_s3 + $0x350] sm:$0xff] }
 0x197   :  { %3085 = vmatprep.subr.bf16.mxu1 %v3084_v3  ;;  %v1225_v27 = vmax.f32 %v4319_v49, 0.0  ;;  %v3116_v3 = vpack.c.bf16 %v2633_v4, %v2631_v46  ;;  %v2649_v49 = vld [vmem:[%s5025_s3 + $0x2d8] sm:$0xff]  ;;  %v2668_v42 = vld [vmem:[%s5025_s3 + $0x370] sm:$0xff]  ;;  %v2671_v4 = vld [vmem:[%s5025_s3 + $0x388] sm:$0xff] }
 0x198   :  { %v3132_v33 = vpack.c.bf16 %v2649_v49, %v2647_v19  ;;  %v1484_v56 = vld [vmem:[#allocation3 + $0xa] sm:$0xff]  ;;  %v2682_v19 = vld [vmem:[%s5025_s3 + $0x3e0] sm:$0xff] }
 0x199   :  { %1229 = vst [vmem:[#allocation3 + $0x20] sm:$0xff] %v1225_v27  ;;  %v2672_v59 = vld [vmem:[%s5025_s3 + $0x390] sm:$0xff] }
 0x19a   :  { %3087 = vmatpush1.bf16.msra.mxu1 %v3086_v0  ;;  %v2636_v0 = vld [vmem:[%s5025_s3 + $0x270] sm:$0xff] }
 0x19b   :  { %3089 = vmatprep.subr.bf16.mxu1 %v3088_v7  ;;  %v2639_v7 = vld [vmem:[%s5025_s3 + $0x288] sm:$0xff]  ;;  %v2684_v49 = vld [vmem:[%s5025_s3 + $0x3f0] sm:$0xff] }
 0x19c   :  { %v3124_v23 = vpack.c.bf16 %v2641_v30, %v2639_v7  ;;  %v2674_v7 = vld [vmem:[%s5025_s3 + $0x3a0] sm:$0xff]  ;;  %v2676_v30 = vld [vmem:[%s5025_s3 + $0x3b0] sm:$0xff]  ;;  %v3170_v6 = vpack.c.bf16 %v2684_v49, %v2682_v19  ;;  %v2722_v49 = vld [vmem:[%s5027_s5 + $0x98] sm:$0xff] }
 0x19d   :  { %v2721_v19 = vld [vmem:[%s5027_s5 + $0x90] sm:$0xff] }
 0x19e   :  { %3091 = vmatpush1.bf16.msra.mxu1 %v3090_v36  ;;  %v3128_v36 = vpack.c.bf16 %v2645_v28, %v2643_v38  ;;  %v2678_v38 = vld [vmem:[%s5025_s3 + $0x3c0] sm:$0xff]  ;;  %v2680_v28 = vld [vmem:[%s5025_s3 + $0x3d0] sm:$0xff] }
 0x19f   :  { %3093 = vmatprep.subr.bf16.mxu1 %v3092_v54  ;;  %v2642_v54 = vld [vmem:[%s5025_s3 + $0x2a0] sm:$0xff] }
 0x1a0   :  { %v1270_v26 = vld [vmem:[#allocation3 + $0x19] sm:$0xff]  ;;  %v1271_v21 = vld [vmem:[#allocation3 + $0x21] sm:$0xff] }
 0x1a1   :  { %1382 = vmatmul.mubr.f32.gmra.mrb[4].mxu1 %v1270_v26  ;;  %v2655_v26 = vld [vmem:[%s5025_s3 + $0x308] sm:$0xff] }
 0x1a2   :  { %3095 = vmatpush1.bf16.msra.mxu1 %v3094_v13  ;;  %1387 = vmatprep.mubr.f32.mxu1 %v3545_v5  ;;  %v2653_v13 = vld [vmem:[%s5025_s3 + $0x2f8] sm:$0xff]  ;;  %v1485_v46 = vld [vmem:[#allocation3 + $0x1a] sm:$0xff]  ;;  %v1486_v1 = vld [vmem:[#allocation3 + $0x22] sm:$0xff] }
 0x1a3   :  { %3097 = vmatprep.subr.bf16.mxu1 %v3096_v55  ;;  %v3136_v55 = vpack.c.bf16 %v2653_v13, %v2651_v52  ;;  %v2686_v52 = vld [vmem:[%s5025_s3 + $0x400] sm:$0xff]  ;;  %v2688_v13 = vld [vmem:[%s5025_s3 + $0x410] sm:$0xff] }
 0x1a4   :  { %v3174_v20 = vpack.c.bf16 %v2688_v13, %v2686_v52  ;;  %v2723_v52 = vld [vmem:[%s5027_s5 + $0xa0] sm:$0xff]  ;;  %v2724_v13 = vld [vmem:[%s5027_s5 + $0xa8] sm:$0xff] }
 0x1a5   :  { %1388 = vmatmul.mubr.f32.gmra.mrb[6].mxu1 %v1271_v21  ;;  %v2661_v21 = vld [vmem:[%s5025_s3 + $0x338] sm:$0xff] }
 0x1a6   :  { %3099 = vmatpush1.bf16.msra.mxu1 %v3098_v44  ;;  %1458 = vmatprep.mubr.f32.mxu1 %v3545_v5  ;;  %v3140_v44 = vpack.c.bf16 %v2657_v8, %v2655_v26  ;;  %v3144_v43 = vpack.c.bf16 %v2661_v21, %v2659_v39  ;;  %v2690_v26 = vld [vmem:[%s5025_s3 + $0x420] sm:$0xff]  ;;  %v2692_v8 = vld [vmem:[%s5025_s3 + $0x430] sm:$0xff] }
 0x1a7   :  { %3101 = vmatprep.subr.bf16.mxu1 %v3100_v50  ;;  %v2654_v50 = vld [vmem:[%s5025_s3 + $0x300] sm:$0xff] }
 0x1a8   :  { %v3142_v17 = vpack.c.bf16 %v2656_v51, %v2654_v50  ;;  %v2697_v50 = vld [vmem:[%s5025_s3 + $0x458] sm:$0xff]  ;;  %v3178_v51 = vpack.c.bf16 %v2692_v8, %v2690_v26  ;;  %v2694_v21 = vld [vmem:[%s5025_s3 + $0x440] sm:$0xff]  ;;  %v2725_v26 = vld [vmem:[%s5027_s5 + $0xb0] sm:$0xff] }
 0x1a9   :  { %v2726_v8 = vld [vmem:[%s5027_s5 + $0xb8] sm:$0xff] }
 0x1aa   :  { %3103 = vmatpush1.bf16.msra.mxu1 %v3102_v29  ;;  %v2658_v29 = vld [vmem:[%s5025_s3 + $0x320] sm:$0xff] }
 0x1ab   :  { %3105 = vmatprep.subr.bf16.mxu1 %v3104_v12  ;;  %v2660_v12 = vld [vmem:[%s5025_s3 + $0x330] sm:$0xff] }
 0x1ac   :  { %v3146_v47 = vpack.c.bf16 %v2660_v12, %v2658_v29  ;;  %v2699_v29 = vld [vmem:[%s5025_s3 + $0x468] sm:$0xff]  ;;  %v2701_v12 = vld [vmem:[%s5025_s3 + $0x478] sm:$0xff] }
 0x1ae   :  { %3107 = vmatpush1.bf16.msra.mxu1 %v3106_v53  ;;  %v3148_v53 = vpack.c.bf16 %v2665_v11, %v2663_v45  ;;  %v3184_v45 = vpack.c.bf16 %v2701_v12, %v2699_v29  ;;  %v2698_v11 = vld [vmem:[%s5025_s3 + $0x460] sm:$0xff]  ;;  %v1919_v29 = vld [vmem:[%s5027_s5 + $0x48] sm:$0xff] }
 0x1af   :  { %3109 = vmatprep.subr.bf16.mxu1 %v3108_v10  ;;  %v2662_v10 = vld [vmem:[%s5025_s3 + $0x340] sm:$0xff] }
 0x1b1   :  { %1459 = vmatmul.mubr.f32.vlgmr.msra.gmra.mrb[0].mxu1 %v1222_v25  ;;  %v3118_v25 = vpack.c.bf16 %v2632_v48, %v2630_v15  ;;  %v2670_v48 = vld [vmem:[%s5025_s3 + $0x380] sm:$0xff] }
 0x1b2   :  { %3111 = vmatpush1.bf16.msra.mxu1 %v3110_v31  ;;  %1464 = vmatprep.mubr.f32.mxu1 %v3545_v5  ;;  %v3150_v31 = vpack.c.bf16 %v2664_v37, %v2662_v10  ;;  %v2703_v10 = vld [vmem:[%s5025_s3 + $0x488] sm:$0xff]  ;;  %v2705_v37 = vld [vmem:[%s5025_s3 + $0x498] sm:$0xff] }
 0x1b3   :  { %3113 = vmatprep.subr.bf16.mxu1 %v3112_v61  ;;  %v3152_v61 = vpack.c.bf16 %v2669_v60, %v2667_v57  ;;  %v3188_v57 = vpack.c.bf16 %v2705_v37, %v2703_v10  ;;  %v2702_v60 = vld [vmem:[%s5025_s3 + $0x480] sm:$0xff]  ;;  %v2732_v37 = vld [vmem:[%s5027_s5 + $0xe8] sm:$0xff] }
 0x1b4   :  { %v2731_v10 = vld [vmem:[%s5027_s5 + $0xe0] sm:$0xff] }
 0x1b5   :  { %1465 = vmatmul.mubr.f32.gmra.mrb[2].mxu1 %v1223_v41  ;;  %v3122_v41 = vpack.c.bf16 %v2636_v0, %v2634_v34  ;;  %v3158_v34 = vpack.c.bf16 %v2672_v59, %v2670_v48  ;;  %v2713_v48 = vld [vmem:[%s5025_s3 + $0x4d8] sm:$0xff] }
 0x1b6   :  { %3115 = vmatpush1.bf16.msra.mxu1 %v3114_v14  ;;  %1470 = vmatprep.mubr.f32.mxu1 %v3545_v5  ;;  %v2673_v14 = vld [vmem:[%s5025_s3 + $0x398] sm:$0xff] }
 0x1b7   :  { %3117 = vmatprep.subr.bf16.mxu1 %v3116_v3  ;;  %v3154_v3 = vpack.c.bf16 %v2668_v42, %v2666_v62  ;;  %v3156_v15 = vpack.c.bf16 %v2673_v14, %v2671_v4  ;;  %v2707_v62 = vld [vmem:[%s5025_s3 + $0x4a8] sm:$0xff]  ;;  %v2709_v42 = vld [vmem:[%s5025_s3 + $0x4b8] sm:$0xff]  ;;  %v2706_v14 = vld [vmem:[%s5025_s3 + $0x4a0] sm:$0xff] }
 0x1b8   :  { %v3192_v4 = vpack.c.bf16 %v2709_v42, %v2707_v62  ;;  %v2733_v62 = vld [vmem:[%s5027_s5 + $0xf0] sm:$0xff]  ;;  %v2734_v42 = vld [vmem:[%s5027_s5 + $0xf8] sm:$0xff] }
 0x1b9   :  { %1471 = vmatmul.mubr.f32.gmra.mrb[4].mxu1 %v1224_v58  ;;  %v3126_v58 = vpack.c.bf16 %v2640_v35, %v2638_v24  ;;  %v3162_v24 = vpack.c.bf16 %v2676_v30, %v2674_v7 }
 0x1ba   :  { %3119 = vmatpush1.bf16.msra.mxu1 %v3118_v25  ;;  %1476 = vmatprep.mubr.f32.mxu1 %v3545_v5  ;;  %v2675_v25 = vld [vmem:[%s5025_s3 + $0x3a8] sm:$0xff] }
 0x1bb   :  { %3121 = vmatprep.subr.bf16.mxu1 %v3120_v63  ;;  %v2677_v63 = vld [vmem:[%s5025_s3 + $0x3b8] sm:$0xff] }
 0x1bc   :  { %v3160_v0 = vpack.c.bf16 %v2677_v63, %v2675_v25  ;;  %v2710_v25 = vld [vmem:[%s5025_s3 + $0x4c0] sm:$0xff]  ;;  %v2712_v63 = vld [vmem:[%s5025_s3 + $0x4d0] sm:$0xff] }
 0x1bd   :  { %1477 = vmatmul.mubr.f32.gmra.mrb[6].mxu1 %v1225_v27  ;;  %v3130_v27 = vpack.c.bf16 %v2644_v18, %v2642_v54  ;;  %v3166_v54 = vpack.c.bf16 %v2680_v28, %v2678_v38  ;;  %v3198_v7 = vpack.c.bf16 %v2712_v63, %v2710_v25  ;;  %v1911_v38 = vld [vmem:[%s5027_s5 + $0x8] sm:$0xff] }
 0x1be   :  { %3123 = vmatpush1.bf16.msra.mxu1 %v3122_v41  ;;  %1584 = vmatprep.mubr.f32.mxu1 %v3545_v5  ;;  %v2679_v41 = vld [vmem:[%s5025_s3 + $0x3c8] sm:$0xff] }
 0x1bf   :  { %3125 = vmatprep.subr.bf16.mxu1 %v3124_v23  ;;  %v2681_v23 = vld [vmem:[%s5025_s3 + $0x3d8] sm:$0xff] }
 0x1c0   :  { %v3164_v35 = vpack.c.bf16 %v2681_v23, %v2679_v41  ;;  %v2714_v41 = vld [vmem:[%s5025_s3 + $0x4e0] sm:$0xff]  ;;  %v2716_v23 = vld [vmem:[%s5025_s3 + $0x4f0] sm:$0xff] }
 0x1c2   :  { %3127 = vmatpush1.bf16.msra.mxu1 %v3126_v58  ;;  %v2683_v58 = vld [vmem:[%s5025_s3 + $0x3e8] sm:$0xff] }
 0x1c3   :  { %3129 = vmatprep.subr.bf16.mxu1 %v3128_v36  ;;  %v2685_v36 = vld [vmem:[%s5025_s3 + $0x3f8] sm:$0xff] }
 0x1c4   :  { %v3168_v18 = vpack.c.bf16 %v2685_v36, %v2683_v58  ;;  %v1751_v58 = vld [vmem:[#allocation3 + $0x4] sm:$0xff]  ;;  %v1752_v36 = vld [vmem:[#allocation3 + $0xc] sm:$0xff] }
 0x1c6   :  { %3131 = vmatpush1.bf16.msra.mxu1 %v3130_v27  ;;  %v2687_v27 = vld [vmem:[%s5025_s3 + $0x408] sm:$0xff] }
 0x1c7   :  { %3133 = vmatprep.subr.bf16.mxu1 %v3132_v33  ;;  %v2689_v33 = vld [vmem:[%s5025_s3 + $0x418] sm:$0xff] }
 0x1c8   :  { %v3172_v40 = vpack.c.bf16 %v2689_v33, %v2687_v27  ;;  %v1912_v27 = vld [vmem:[%s5027_s5 + $0x10] sm:$0xff]  ;;  %v3208_v33 = vpack.c.bf16 %v2722_v49, %v2721_v19 }
 0x1ca   :  { %3135 = vmatpush1.bf16.msra.mxu1 %v3134_v2  ;;  %v2691_v2 = vld [vmem:[%s5025_s3 + $0x428] sm:$0xff]  ;;  %3209 = vmatpush3.bf16.msra.mxu0 %v3208_v33 }
 0x1cb   :  { %3137 = vmatprep.subr.bf16.mxu1 %v3136_v55  ;;  %v2693_v55 = vld [vmem:[%s5025_s3 + $0x438] sm:$0xff]  ;;  %3210 = vmatprep.subr.bf16.mxu0 %v3546_v16 }
 0x1cc   :  { %v3176_v22 = vpack.c.bf16 %v2693_v55, %v2691_v2  ;;  %v1914_v2 = vld [vmem:[%s5027_s5 + $0x20] sm:$0xff]  ;;  %v3211_v55 = vpack.c.bf16 %v2724_v13, %v2723_v52 }
 0x1ce   :  { %3139 = vmatpush1.bf16.msra.mxu1 %v3138_v9  ;;  %v1617_v9 = vld [vmem:[#allocation3 + $0x3] sm:$0xff]  ;;  %3212 = vmatpush3.bf16.msra.mxu0 %v3211_v55 }
 0x1cf   :  { %3141 = vmatprep.subr.bf16.mxu1 %v3140_v44  ;;  %v2695_v44 = vld [vmem:[%s5025_s3 + $0x448] sm:$0xff]  ;;  %3213 = vmatprep.subr.bf16.mxu0 %v3546_v16 }
 0x1d0   :  { %v3180_v39 = vpack.c.bf16 %v2697_v50, %v2695_v44  ;;  %v3214_v44 = vpack.c.bf16 %v2726_v8, %v2725_v26  ;;  %v1917_v50 = vld [vmem:[%s5027_s5 + $0x38] sm:$0xff]  ;;  %v2736_v55 = vld [vmem:[%s5027_s5 + $0x108] sm:$0xff] }
 0x1d1   :  { %1585 = vmatmul.mubr.f32.vlgmr.msra.gmra.mrb[0].mxu1 %v1483_v32 }
 0x1d2   :  { %3143 = vmatpush1.bf16.msra.mxu1 %v3142_v17  ;;  %1590 = vmatprep.mubr.f32.mxu1 %v3545_v5  ;;  %v2696_v17 = vld [vmem:[%s5025_s3 + $0x450] sm:$0xff] }
 0x1d3   :  { %3145 = vmatprep.subr.bf16.mxu1 %v3144_v43  ;;  %v1618_v43 = vld [vmem:[#allocation3 + $0xb] sm:$0xff]  ;;  %v3182_v32 = vpack.c.bf16 %v2696_v17, %v2694_v21  ;;  %3215 = vmatpush3.bf16.msra.mxu0 %v3214_v44  ;;  %v2728_v21 = vld [vmem:[%s5027_s5 + $0xc8] sm:$0xff]  ;;  %v1918_v17 = vld [vmem:[%s5027_s5 + $0x40] sm:$0xff] }
 0x1d4   :  { %3216 = vmatprep.subr.bf16.mxu0 %v3546_v16  ;;  %v3241_v12 = vpack.c.bf16 %v1919_v29, %v1918_v17 }
 0x1d5   :  { %1591 = vmatmul.mubr.f32.gmra.mrb[2].mxu1 %v1484_v56 }
 0x1d6   :  { %3147 = vmatpush1.bf16.msra.mxu1 %v3146_v47  ;;  %1596 = vmatprep.mubr.f32.mxu1 %v3545_v5  ;;  %v2700_v47 = vld [vmem:[%s5025_s3 + $0x470] sm:$0xff] }
 0x1d7   :  { %3149 = vmatprep.subr.bf16.mxu1 %v3148_v53  ;;  %v1619_v53 = vld [vmem:[#allocation3 + $0x1b] sm:$0xff]  ;;  %v3186_v56 = vpack.c.bf16 %v2700_v47, %v2698_v11  ;;  %v1920_v11 = vld [vmem:[%s5027_s5 + $0x50] sm:$0xff] }
 0x1d9   :  { %1597 = vmatmul.mubr.f32.gmra.mrb[4].mxu1 %v1485_v46 }
 0x1da   :  { %3151 = vmatpush1.bf16.msra.mxu1 %v3150_v31  ;;  %1602 = vmatprep.mubr.f32.mxu1 %v3545_v5  ;;  %v2704_v31 = vld [vmem:[%s5025_s3 + $0x490] sm:$0xff] }
 0x1db   :  { %3153 = vmatprep.subr.bf16.mxu1 %v3152_v61  ;;  %v1620_v61 = vld [vmem:[#allocation3 + $0x23] sm:$0xff]  ;;  %v3190_v46 = vpack.c.bf16 %v2704_v31, %v2702_v60  ;;  %v3223_v31 = vpack.c.bf16 %v2732_v37, %v2731_v10  ;;  %v2738_v10 = vld [vmem:[%s5027_s5 + $0x118] sm:$0xff] }
 0x1dc   :  { %v1923_v60 = vld [vmem:[%s5027_s5 + $0x68] sm:$0xff] }
 0x1dd   :  { %1603 = vmatmul.mubr.f32.gmra.mrb[6].mxu1 %v1486_v1 }
 0x1de   :  { %3155 = vmatpush1.bf16.msra.mxu1 %v3154_v3  ;;  %1718 = vmatprep.mubr.f32.mxu1 %v3545_v5  ;;  %v2708_v3 = vld [vmem:[%s5025_s3 + $0x4b0] sm:$0xff] }
 0x1df   :  { %3157 = vmatprep.subr.bf16.mxu1 %v3156_v15  ;;  %v2711_v15 = vld [vmem:[%s5025_s3 + $0x4c8] sm:$0xff]  ;;  %v3194_v59 = vpack.c.bf16 %v2708_v3, %v2706_v14 }
 0x1e0   :  { %v3196_v1 = vpack.c.bf16 %v2713_v48, %v2711_v15 }
 0x1e2   :  { %3159 = vmatpush1.bf16.msra.mxu1 %v3158_v34  ;;  %v2715_v34 = vld [vmem:[%s5025_s3 + $0x4e8] sm:$0xff] }
 0x1e3   :  { %3161 = vmatprep.subr.bf16.mxu1 %v3160_v0  ;;  %v2717_v0 = vld [vmem:[%s5025_s3 + $0x4f8] sm:$0xff] }
 0x1e4   :  { %v3200_v30 = vpack.c.bf16 %v2717_v0, %v2715_v34 }
 0x1e6   :  { %3163 = vmatpush1.bf16.msra.mxu1 %v3162_v24  ;;  %v3202_v24 = vpack.c.bf16 %v2716_v23, %v2714_v41 }
 0x1e7   :  { %3165 = vmatprep.subr.bf16.mxu1 %v3164_v35  ;;  %v1910_v35 = vld [vmem:[%s5027_s5] sm:$0xff] }
 0x1e8   :  { %v3229_v28 = vpack.c.bf16 %v1911_v38, %v1910_v35 }
 0x1ea   :  { %3167 = vmatpush1.bf16.msra.mxu1 %v3166_v54  ;;  %v1753_v54 = vld [vmem:[#allocation3 + $0x1c] sm:$0xff] }
 0x1eb   :  { %3169 = vmatprep.subr.bf16.mxu1 %v3168_v18  ;;  %v1754_v18 = vld [vmem:[#allocation3 + $0x24] sm:$0xff] }
 0x1ee   :  { %3171 = vmatpush1.bf16.msra.mxu1 %v3170_v6  ;;  %v1913_v6 = vld [vmem:[%s5027_s5 + $0x18] sm:$0xff] }
 0x1ef   :  { %3173 = vmatprep.subr.bf16.mxu1 %v3172_v40  ;;  %v3232_v40 = vpack.c.bf16 %v1913_v6, %v1912_v27 }
 0x1f1   :  { %1719 = vmatmul.mubr.f32.vlgmr.msra.gmra.mrb[0].mxu1 %v1617_v9  ;;  %v1916_v9 = vld [vmem:[%s5027_s5 + $0x30] sm:$0xff] }
 0x1f2   :  { %3175 = vmatpush1.bf16.msra.mxu1 %v3174_v20  ;;  %1724 = vmatprep.mubr.f32.mxu1 %v3545_v5  ;;  %v1915_v20 = vld [vmem:[%s5027_s5 + $0x28] sm:$0xff] }
 0x1f3   :  { %3177 = vmatprep.subr.bf16.mxu1 %v3176_v22  ;;  %v3235_v22 = vpack.c.bf16 %v1915_v20, %v1914_v2  ;;  %v2735_v2 = vld [vmem:[%s5027_s5 + $0x100] sm:$0xff] }
 0x1f4   :  { %v3253_v17 = vpack.c.bf16 %v2736_v55, %v2735_v2  ;;  %v2747_v2 = vld [vmem:[%s5027_s5 + $0x160] sm:$0xff]  ;;  %v2748_v55 = vld [vmem:[%s5027_s5 + $0x168] sm:$0xff] }
 0x1f5   :  { %1725 = vmatmul.mubr.f32.gmra.mrb[2].mxu1 %v1618_v43 }
 0x1f6   :  { %3179 = vmatpush1.bf16.msra.mxu1 %v3178_v51  ;;  %1730 = vmatprep.mubr.f32.mxu1 %v3545_v5  ;;  %v3238_v51 = vpack.c.bf16 %v1917_v50, %v1916_v9  ;;  %v2751_v50 = vld [vmem:[%s5027_s5 + $0x180] sm:$0xff] }
 0x1f7   :  { %3181 = vmatprep.subr.bf16.mxu1 %v3180_v39  ;;  %v2727_v39 = vld [vmem:[%s5027_s5 + $0xc0] sm:$0xff] }
 0x1f8   :  { %v3217_v43 = vpack.c.bf16 %v2728_v21, %v2727_v39 }
 0x1f9   :  { %1731 = vmatmul.mubr.f32.gmra.mrb[4].mxu1 %v1619_v53  ;;  %v1921_v53 = vld [vmem:[%s5027_s5 + $0x58] sm:$0xff] }
 0x1fa   :  { %3183 = vmatpush1.bf16.msra.mxu1 %v3182_v32  ;;  %1736 = vmatprep.mubr.f32.mxu1 %v3545_v5  ;;  %v2729_v32 = vld [vmem:[%s5027_s5 + $0xd0] sm:$0xff] }
 0x1fb   :  { %3185 = vmatprep.subr.bf16.mxu1 %v3184_v45  ;;  %3218 = vmatpush3.bf16.msra.mxu0 %v3217_v43  ;;  %v2730_v45 = vld [vmem:[%s5027_s5 + $0xd8] sm:$0xff] }
 0x1fc   :  { %3219 = vmatprep.subr.bf16.mxu0 %v3546_v16  ;;  %v3220_v47 = vpack.c.bf16 %v2730_v45, %v2729_v32 }
 0x1fd   :  { %1737 = vmatmul.mubr.f32.gmra.mrb[6].mxu1 %v1620_v61 }
 0x1fe   :  { %3187 = vmatpush1.bf16.msra.mxu1 %v3186_v56  ;;  %1852 = vmatprep.mubr.f32.mxu1 %v3545_v5  ;;  %v3244_v56 = vpack.c.bf16 %v1921_v53, %v1920_v11  ;;  %v2737_v53 = vld [vmem:[%s5027_s5 + $0x110] sm:$0xff] }
 0x1ff   :  { %3189 = vmatprep.subr.bf16.mxu1 %v3188_v57  ;;  %v1922_v57 = vld [vmem:[%s5027_s5 + $0x60] sm:$0xff]  ;;  %3221 = vmatpush3.bf16.msra.mxu0 %v3220_v47 }
 0x200   :  { %3222 = vmatprep.subr.bf16.mxu0 %v3546_v16  ;;  %v3247_v61 = vpack.c.bf16 %v1923_v60, %v1922_v57  ;;  %v2754_v57 = vld [vmem:[%s5027_s5 + $0x198] sm:$0xff] }
 0x202   :  { %3191 = vmatpush1.bf16.msra.mxu1 %v3190_v46  ;;  %v1925_v46 = vld [vmem:[%s5027_s5 + $0x78] sm:$0xff] }
 0x203   :  { %3193 = vmatprep.subr.bf16.mxu1 %v3192_v4  ;;  %3224 = vmatpush3.bf16.msra.mxu0 %v3223_v31  ;;  %v3226_v4 = vpack.c.bf16 %v2734_v42, %v2733_v62 }
 0x204   :  { %3225 = vmatprep.subr.bf16.mxu0 %v3546_v16 }
 0x206   :  { %3195 = vmatpush1.bf16.msra.mxu1 %v3194_v59 }
 0x207   :  { %3197 = vmatprep.subr.bf16.mxu1 %v3196_v1  ;;  %3227 = vmatpush3.bf16.msra.mxu0 %v3226_v4  ;;  %v2740_v4 = vld [vmem:[%s5027_s5 + $0x128] sm:$0xff] }
 0x208   :  { %3252 = vmatprep.subr.bf16.mxu0 %v3546_v16 }
 0x20a   :  { %3199 = vmatpush1.bf16.msra.mxu1 %v3198_v7 }
 0x20b   :  { %3201 = vmatprep.subr.bf16.mxu1 %v3200_v30 }
 0x20e   :  { %3203 = vmatpush1.bf16.msra.mxu1 %v3202_v24 }
 0x20f   :  { %3228 = vmatprep.subr.bf16.mxu1 %v3546_v16 }
 0x211   :  { %1853 = vmatmul.mubr.f32.vlgmr.msra.gmra.mrb[0].mxu1 %v1751_v58 }
 0x212   :  { %1858 = vmatprep.mubr.f32.mxu1 %v3545_v5  ;;  %3230 = vmatpush3.bf16.msra.mxu1 %v3229_v28  ;;  %v4813_v28 = vld [vmem:[%s5026_s4] ss:$0 sm:$0xff] }
 0x213   :  { %3231 = vmatprep.subr.bf16.mxu1 %v3546_v16 }
 0x215   :  { %1859 = vmatmul.mubr.f32.gmra.mrb[2].mxu1 %v1752_v36 }
 0x216   :  { %1864 = vmatprep.mubr.f32.mxu1 %v3545_v5  ;;  %3233 = vmatpush3.bf16.msra.mxu1 %v3232_v40 }
 0x217   :  { %3234 = vmatprep.subr.bf16.mxu1 %v3546_v16 }
 0x219   :  { %1865 = vmatmul.mubr.f32.gmra.mrb[4].mxu1 %v1753_v54 }
 0x21a   :  { %1870 = vmatprep.mubr.f32.mxu1 %v3545_v5  ;;  %3236 = vmatpush3.bf16.msra.mxu1 %v3235_v22 }
 0x21b   :  { %3237 = vmatprep.subr.bf16.mxu1 %v3546_v16 }
 0x21d   :  { %1871 = vmatmul.mubr.f32.gmra.mrb[6].mxu1 %v1754_v18 }
 0x21e   :  { %3239 = vmatpush3.bf16.msra.mxu1 %v3238_v51  ;;  %2936 = vmatprep.mubr.msk.f32.mxu1 %vm3547_vm13, %v3545_v5  ;;  %v1924_v5 = vld [vmem:[%s5027_s5 + $0x70] sm:$0xff]  ;;  %v2752_v51 = vld [vmem:[%s5027_s5 + $0x188] sm:$0xff] }
 0x21f   :  { %3240 = vmatprep.subr.bf16.mxu1 %v3546_v16  ;;  %v3250_v14 = vpack.c.bf16 %v1925_v46, %v1924_v5  ;;  %v3277_v47 = vpack.c.bf16 %v2752_v51, %v2751_v50  ;;  %v2739_v46 = vld [vmem:[%s5027_s5 + $0x120] sm:$0xff] }
 0x222   :  { %3242 = vmatpush3.bf16.msra.mxu1 %v3241_v12 }
 0x223   :  { %3243 = vmatprep.subr.bf16.mxu1 %v3546_v16 }
 0x226   :  { %3245 = vmatpush3.bf16.msra.mxu1 %v3244_v56  ;;  %v2753_v56 = vld [vmem:[%s5027_s5 + $0x190] sm:$0xff] }
 0x227   :  { %3246 = vmatprep.subr.bf16.mxu1 %v3546_v16  ;;  %v3280_v5 = vpack.c.bf16 %v2754_v57, %v2753_v56 }
 0x22a   :  { %3248 = vmatpush3.bf16.msra.mxu1 %v3247_v61  ;;  %v3256_v61 = vpack.c.bf16 %v2738_v10, %v2737_v53 }
 0x22b   :  { %3249 = vmatprep.subr.bf16.mxu1 %v3546_v16 }
 0x22e   :  { %3251 = vmatpush3.bf16.msra.mxu1 %v3250_v14  ;;  %v2755_v14 = vld [vmem:[%s5027_s5 + $0x1a0] sm:$0xff] }
 0x22f   :  { %3276 = vmatprep.subr.bf16.mxu1 %v3546_v16 }
 0x2e4   :  { %v1854_v3 = vpop.f32.mrb[0].mxu1 }
 0x2e5   :  { %v1856_v15 = vpop.f32.mrb[1].mxu1 }
 0x2e6   :  { %v1885_v48 = vmax.f32 %v1854_v3, %v1856_v15  ;;  %v2756_v3 = vld [vmem:[%s5027_s5 + $0x1a8] sm:$0xff]  ;;  %v4861_v15 = vld [vmem:[#allocation3 + $0x10] sm:$0xff] }
 0x2e8   :  { %1889 = vst [vmem:[#allocation4] sm:$0xff] %v1885_v48  ;;  %v1860_v59 = vpop.f32.mrb[2].mxu1 }
 0x2e9   :  { %v1862_v1 = vpop.f32.mrb[3].mxu1 }
 0x2ea   :  { %v1886_v25 = vmax.f32 %v1860_v59, %v1862_v1  ;;  %v3259_v59 = vpack.c.bf16 %v2740_v4, %v2739_v46  ;;  %v3283_v1 = vpack.c.bf16 %v2756_v3, %v2755_v14  ;;  %v2770_v4 = vld [vmem:[%s5027_s5 + $0x218] sm:$0xff] }
 0x2ec   :  { %1890 = vst [vmem:[#allocation4 + $0x8] sm:$0xff] %v1886_v25  ;;  %v1866_v63 = vpop.f32.mrb[4].mxu1  ;;  %v2741_v25 = vld [vmem:[%s5027_s5 + $0x130] sm:$0xff] }
 0x2ed   :  { %v1868_v34 = vpop.f32.mrb[5].mxu1 }
 0x2ee   :  { %v1887_v0 = vmax.f32 %v1866_v63, %v1868_v34  ;;  %v2742_v63 = vld [vmem:[%s5027_s5 + $0x138] sm:$0xff]  ;;  %v2757_v34 = vld [vmem:[%s5027_s5 + $0x1b0] sm:$0xff] }
 0x2ef   :  { %v1926_v23 = vld [vmem:[#allocation4 + $0x2] sm:$0x1]  ;;  %v1928_v24 = vld [vmem:[#allocation4 + $0x3] sm:$0x1]  ;;  %v1893_v35 = vld [vmem:[#allocation4] sm:$0x1] }
 0x2f0   :  { %1891 = vst [vmem:[#allocation4 + $0x10] sm:$0xff] %v1887_v0  ;;  %v1872_v7 = vpop.f32.mrb[6].mxu1  ;;  %v1895_v38 = vld [vmem:[#allocation4 + $0x1] sm:$0x1]  ;;  %v1930_v58 = vmax.f32 %v1926_v23, %v1928_v24  ;;  %v2744_v23 = vld [vmem:[%s5027_s5 + $0x148] sm:$0xff]  ;;  %v2759_v24 = vld [vmem:[%s5027_s5 + $0x1c0] sm:$0xff] }
 0x2f1   :  { %v1874_v30 = vpop.f32.mrb[7].mxu1  ;;  %v1897_v27 = vmax.f32 %v1893_v35, %v1895_v38  ;;  %v2758_v0 = vld [vmem:[%s5027_s5 + $0x1b8] sm:$0xff]  ;;  %v2760_v35 = vld [vmem:[%s5027_s5 + $0x1c8] sm:$0xff] }
 0x2f2   :  { %v1888_v41 = vmax.f32 %v1872_v7, %v1874_v30  ;;  %v1932_v52 = vadd.f32 %v4813_v28, %v1930_v58  ;;  %v3262_v7 = vpack.c.bf16 %v2742_v63, %v2741_v25  ;;  %v3286_v30 = vpack.c.bf16 %v2758_v0, %v2757_v34  ;;  %v2207_v50 = vld [vmem:[#allocation4 + $0x6] sm:$0x1]  ;;  %v2209_v51 = vld [vmem:[#allocation4 + $0x7] sm:$0x1]  ;;  %v2772_v25 = vld [vmem:[%s5027_s5 + $0x228] sm:$0xff] }
 0x2f3   :  { %v2310_v36 = vld [vmem:[#allocation4 + $0x8] sm:$0x1]  ;;  %v2312_v54 = vld [vmem:[#allocation4 + $0x9] sm:$0x1]  ;;  %v1906_v22 = vadd.f32 %v4813_v28, %v1897_v27  ;;  %v2746_v27 = vld [vmem:[%s5027_s5 + $0x158] sm:$0xff] }
 0x2f4   :  { %1892 = vst [vmem:[#allocation4 + $0x18] sm:$0xff] %v1888_v41  ;;  %v2314_v20 = vmax.f32 %v2310_v36, %v2312_v54  ;;  %v1934_v43 = vmax.f32 %v1932_v52, 0.0  ;;  %v2743_v41 = vld [vmem:[%s5027_s5 + $0x140] sm:$0xff]  ;;  %v2773_v34 = vld [vmem:[%s5027_s5 + $0x230] sm:$0xff]  ;;  %v2774_v0 = vld [vmem:[%s5027_s5 + $0x238] sm:$0xff] }
 0x2f5   :  { %v1908_v45 = vmax.f32 %v1906_v22, 0.0  ;;  %v3265_v36 = vpack.c.bf16 %v2744_v23, %v2743_v41  ;;  %v2763_v22 = vld [vmem:[%s5027_s5 + $0x1e0] sm:$0xff]  ;;  %v2777_v23 = vld [vmem:[%s5027_s5 + $0x250] sm:$0xff] }
 0x2f6   :  { %v2316_v12 = vadd.f32 %v4813_v28, %v2314_v20 }
 0x2f7   :  { %v1927_v18 = vld [vmem:[#allocation4 + $0x12] sm:$0x1]  ;;  %v1929_v19 = vld [vmem:[#allocation4 + $0x13] sm:$0x1]  ;;  %v1894_v49 = vld [vmem:[#allocation4 + $0x10] sm:$0x1] }
 0x2f8   :  { %v1931_v33 = vmax.f32 %v1927_v18, %v1929_v19  ;;  %v1896_v6 = vld [vmem:[#allocation4 + $0x11] sm:$0x1]  ;;  %v2318_v62 = vmax.f32 %v2316_v12, 0.0  ;;  %v2105_v38 = vld [vmem:[#allocation4 + $0x14] sm:$0x1]  ;;  %v3289_v19 = vpack.c.bf16 %v2760_v35, %v2759_v24  ;;  %v2750_v12 = vld [vmem:[%s5027_s5 + $0x178] sm:$0xff] }
 0x2f9   :  { %v1898_v40 = vmax.f32 %v1894_v49, %v1896_v6  ;;  %v2107_v58 = vld [vmem:[#allocation4 + $0x15] sm:$0x1]  ;;  %v2208_v54 = vld [vmem:[#allocation4 + $0x16] sm:$0x1]  ;;  %v2210_v18 = vld [vmem:[#allocation4 + $0x17] sm:$0x1] }
 0x2fa   :  { %v1933_v13 = vadd.f32 %v4813_v28, %v1931_v33  ;;  %v2745_v49 = vld [vmem:[%s5027_s5 + $0x150] sm:$0xff]  ;;  %v2762_v6 = vld [vmem:[%s5027_s5 + $0x1d8] sm:$0xff]  ;;  %v2212_v52 = vmax.f32 %v2208_v54, %v2210_v18 }
 0x2fb   :  { %v1907_v26 = vadd.f32 %v4813_v28, %v1898_v40  ;;  %v2311_v8 = vld [vmem:[#allocation4 + $0x18] sm:$0x1]  ;;  %v2313_v9 = vld [vmem:[#allocation4 + $0x19] sm:$0x1]  ;;  %v2109_v40 = vmax.f32 %v2105_v38, %v2107_v58  ;;  %v2778_v24 = vld [vmem:[%s5027_s5 + $0x258] sm:$0xff] }
 0x2fc   :  { %v1935_v44 = vmax.f32 %v1933_v13, 0.0  ;;  %v2315_v39 = vmax.f32 %v2311_v8, %v2313_v9  ;;  %v2761_v33 = vld [vmem:[%s5027_s5 + $0x1d0] sm:$0xff]  ;;  %v3268_v13 = vpack.c.bf16 %v2746_v27, %v2745_v49  ;;  %v2106_v8 = vld [vmem:[#allocation4 + $0x5] sm:$0x1]  ;;  %v2764_v9 = vld [vmem:[%s5027_s5 + $0x1e8] sm:$0xff]  ;;  %v3316_v35 = vpack.c.bf16 %v2778_v24, %v2777_v23 }
 0x2fd   :  { %v1909_v21 = vmax.f32 %v1907_v26, 0.0  ;;  %v3292_v20 = vpack.c.bf16 %v2762_v6, %v2761_v33  ;;  %v2104_v26 = vld [vmem:[#allocation4 + $0x4] sm:$0x1]  ;;  %v2779_v38 = vld [vmem:[%s5027_s5 + $0x260] sm:$0xff]  ;;  %v2780_v58 = vld [vmem:[%s5027_s5 + $0x268] sm:$0xff] }
 0x2fe   :  { %v1955_v29 = vrot.slane %v1935_v44, 7  ;;  %v2317_v32 = vadd.f32 %v4813_v28, %v2315_v39  ;;  %v2111_v44 = vadd.f32 %v4813_v28, %v2109_v40  ;;  %v2214_v39 = vadd.f32 %v4813_v28, %v2212_v52  ;;  %v2781_v54 = vld [vmem:[%s5027_s5 + $0x270] sm:$0xff]  ;;  %v2782_v18 = vld [vmem:[%s5027_s5 + $0x278] sm:$0xff] }
 0x2ff   :  { %v2031_v11 = vrot.slane %v1909_v21, 7  ;;  %v3271_v21 = vpack.c.bf16 %v2748_v55, %v2747_v2 }
 0x300   :  { %v1957_v37 = vsel %vm1956_vm14, %v1955_v29, %v1934_v43  ;;  %v2319_v60 = vmax.f32 %v2317_v32, 0.0  ;;  %v3295_v43 = vpack.c.bf16 %v2764_v9, %v2763_v22  ;;  %v2749_v29 = vld [vmem:[%s5027_s5 + $0x170] sm:$0xff]  ;;  %v2211_v32 = vmax.f32 %v2207_v50, %v2209_v51 }
 0x301   :  { %2902 = vmatmul.mubr.f32.vlgmr.msra.gmra.mrb[16].mxu0 %v1957_v37  ;;  %v2032_v31 = vsel %vm1956_vm14, %v2031_v11, %v1908_v45  ;;  %v2765_v45 = vld [vmem:[%s5027_s5 + $0x1f0] sm:$0xff]  ;;  %v2766_v11 = vld [vmem:[%s5027_s5 + $0x1f8] sm:$0xff]  ;;  %v2216_v53 = vmax.f32 %v2214_v39, 0.0  ;;  %v3274_v10 = vpack.c.bf16 %v2750_v12, %v2749_v29 }
 0x302   :  { %2937 = vmatmul.mubr.f32.vlgmr.msra.gmra.mrb[8].mxu1 %v2032_v31  ;;  %3254 = vmatpush3.bf16.msra.mxu0 %v3253_v17  ;;  %v2339_v42 = vrot.slane %v2319_v60, 7  ;;  %v2108_v17 = vmax.f32 %v2104_v26, %v2106_v8  ;;  %v3298_v56 = vpack.c.bf16 %v2766_v11, %v2765_v45  ;;  %v2213_v57 = vadd.f32 %v4813_v28, %v2211_v32  ;;  %v2767_v60 = vld [vmem:[%s5027_s5 + $0x200] sm:$0xff]  ;;  %v2768_v31 = vld [vmem:[%s5027_s5 + $0x208] sm:$0xff] }
 0x303   :  { %3278 = vmatpush3.bf16.msra.mxu1 %v3277_v47  ;;  %3255 = vmatprep.subr.bf16.mxu0 %v3546_v16  ;;  %v2113_v47 = vmax.f32 %v2111_v44, 0.0  ;;  %v2783_v8 = vld [vmem:[%s5028_s6] ss:$0 sm:$0xff] }
 0x304   :  { %3279 = vmatprep.subr.bf16.mxu1 %v3546_v16  ;;  %2971 = vmatprep.mubr.msk.f32.mxu0 %vm3547_vm13, %v4861_v15  ;;  %v4866_v48 = vsel %vm1956_vm14, %v2339_v42, %v2318_v62  ;;  %v2110_v37 = vadd.f32 %v4813_v28, %v2108_v17  ;;  %v2236_v62 = vrot.slane %v2216_v53, 7  ;;  %v2215_v46 = vmax.f32 %v2213_v57, 0.0  ;;  %v2769_v28 = vld [vmem:[%s5027_s5 + $0x210] sm:$0xff] }
 0x305   :  { %3006 = vmatprep.mubr.msk.f32.mxu1 %vm3547_vm13, %v4861_v15 }
 0x306   :  { %3257 = vmatpush3.bf16.msra.mxu0 %v3256_v61  ;;  %v2133_v61 = vrot.slane %v2113_v47, 7  ;;  %v2112_v42 = vmax.f32 %v2110_v37, 0.0  ;;  %v2237_v3 = vsel %vm1956_vm14, %v2236_v62, %v2215_v46 }
 0x307   :  { %3281 = vmatpush3.bf16.msra.mxu1 %v3280_v5  ;;  %3258 = vmatprep.subr.bf16.mxu0 %v3546_v16  ;;  %v3301_v5 = vpack.c.bf16 %v2768_v31, %v2767_v60 }
 0x308   :  { %3282 = vmatprep.subr.bf16.mxu1 %v3546_v16  ;;  %v2134_v14 = vsel %vm1956_vm14, %v2133_v61, %v2112_v42 }
 0x30a   :  { %3260 = vmatpush3.bf16.msra.mxu0 %v3259_v59  ;;  %v3304_v59 = vpack.c.bf16 %v2770_v4, %v2769_v28 }
 0x30b   :  { %3284 = vmatpush3.bf16.msra.mxu1 %v3283_v1  ;;  %3261 = vmatprep.subr.bf16.mxu0 %v3546_v16  ;;  %v2771_v1 = vld [vmem:[%s5027_s5 + $0x220] sm:$0xff] }
 0x30c   :  { %3285 = vmatprep.subr.bf16.mxu1 %v3546_v16  ;;  %v3307_v63 = vpack.c.bf16 %v2772_v25, %v2771_v1 }
 0x30e   :  { %3263 = vmatpush3.bf16.msra.mxu0 %v3262_v7  ;;  %v3310_v7 = vpack.c.bf16 %v2774_v0, %v2773_v34 }
 0x30f   :  { %3287 = vmatpush3.bf16.msra.mxu1 %v3286_v30  ;;  %3264 = vmatprep.subr.bf16.mxu0 %v3546_v16  ;;  %v2776_v30 = vld [vmem:[%s5027_s5 + $0x248] sm:$0xff] }
 0x310   :  { %3288 = vmatprep.subr.bf16.mxu1 %v3546_v16 }
 0x312   :  { %3266 = vmatpush3.bf16.msra.mxu0 %v3265_v36  ;;  %v3319_v36 = vpack.c.bf16 %v2780_v58, %v2779_v38 }
 0x313   :  { %3290 = vmatpush3.bf16.msra.mxu1 %v3289_v19  ;;  %3267 = vmatprep.subr.bf16.mxu0 %v3546_v16  ;;  %v3322_v19 = vpack.c.bf16 %v2782_v18, %v2781_v54 }
 0x314   :  { %3291 = vmatprep.subr.bf16.mxu1 %v3546_v16 }
 0x316   :  { %3269 = vmatpush3.bf16.msra.mxu0 %v3268_v13 }
 0x317   :  { %3293 = vmatpush3.bf16.msra.mxu1 %v3292_v20  ;;  %3270 = vmatprep.subr.bf16.mxu0 %v3546_v16 }
 0x318   :  { %3294 = vmatprep.subr.bf16.mxu1 %v3546_v16 }
 0x31a   :  { %3272 = vmatpush3.bf16.msra.mxu0 %v3271_v21 }
 0x31b   :  { %3296 = vmatpush3.bf16.msra.mxu1 %v3295_v43  ;;  %3273 = vmatprep.subr.bf16.mxu0 %v3546_v16 }
 0x31c   :  { %3297 = vmatprep.subr.bf16.mxu1 %v3546_v16 }
 0x31e   :  { %3275 = vmatpush3.bf16.msra.mxu0 %v3274_v10 }
 0x31f   :  { %3299 = vmatpush3.bf16.msra.mxu1 %v3298_v56  ;;  %3300 = vmatprep.subr.bf16.mxu0 %v3546_v16 }
 0x321   :  { %2972 = vmatmul.mubr.f32.vlgmr.msra.gmra.mrb[18].mxu0 %v2134_v14 }
 0x322   :  { %3007 = vmatmul.mubr.f32.vlgmr.msra.gmra.mrb[10].mxu1 %v2237_v3  ;;  %3302 = vmatpush3.bf16.msra.mxu0 %v3301_v5 }
 0x323   :  { %3303 = vmatprep.subr.bf16.mxu0 %v3546_v16  ;;  %3041 = vmatprep.mubr.msk.f32.mxu0 %vm3547_vm13, %v4861_v15  ;;  %v2775_v15 = vld [vmem:[%s5027_s5 + $0x240] sm:$0xff] }
 0x324   :  { %v3313_v41 = vpack.c.bf16 %v2776_v30, %v2775_v15 }
 0x326   :  { %3305 = vmatpush3.bf16.msra.mxu0 %v3304_v59 }
 0x327   :  { %3306 = vmatprep.subr.bf16.mxu0 %v3546_v16 }
 0x32a   :  { %3308 = vmatpush3.bf16.msra.mxu0 %v3307_v63 }
 0x32b   :  { %3309 = vmatprep.subr.bf16.mxu0 %v3546_v16 }
 0x32e   :  { %3311 = vmatpush3.bf16.msra.mxu0 %v3310_v7 }
 0x32f   :  { %3312 = vmatprep.subr.bf16.mxu0 %v3546_v16 }
 0x332   :  { %3314 = vmatpush3.bf16.msra.mxu0 %v3313_v41 }
 0x333   :  { %3315 = vmatprep.subr.bf16.mxu0 %v3546_v16 }
 0x336   :  { %3317 = vmatpush3.bf16.msra.mxu0 %v3316_v35 }
 0x337   :  { %3318 = vmatprep.subr.bf16.mxu0 %v3546_v16 }
 0x33a   :  { %3320 = vmatpush3.bf16.msra.mxu0 %v3319_v36 }
 0x33b   :  { %3321 = vmatprep.subr.bf16.mxu0 %v3546_v16 }
 0x33e   :  { %3323 = vmatpush3.bf16.msra.mxu0 %v3322_v19 }
 0x341   :  { %3042 = vmatmul.mubr.f32.vlgmr.msra.gmra.mrb[20].mxu0 %v4866_v48 }
 0x3d4   :  { %v2025_v49 = vpop.f32.mrb[16].mxu0 }
 0x3d5   :  { %v2100_v27 = vpop.f32.mrb[8].mxu1  ;;  %v2903_v33 = vpop.f32.mrb[17].mxu0 }
 0x3d6   :  { %v2101_v6 = vadd.f32 %v2100_v27, %v2025_v49  ;;  %v2938_v40 = vpop.f32.mrb[9].mxu1 }
 0x3f4   :  { %v2202_v52 = vpop.f32.mrb[18].mxu0 }
 0x3f5   :  { %v2206_v13 = vadd.f32 %v2202_v52, %v2101_v6  ;;  %v2305_v2 = vpop.f32.mrb[10].mxu1  ;;  %v2973_v55 = vpop.f32.mrb[19].mxu0 }
 0x3f6   :  { %v3008_v20 = vpop.f32.mrb[11].mxu1 }
 0x3f7   :  { %v2309_v22 = vadd.f32 %v2305_v2, %v2206_v13 }
 0x414   :  { %v2408_v26 = vpop.f32.mrb[20].mxu0 }
 0x415   :  { %v2412_v16 = vadd.f32 %v2408_v26, %v2309_v22  ;;  %v3043_v9 = vpop.f32.mrb[21].mxu0 }
 0x417   :  { %v2420_v48 = vadd.f32 %v2783_v8, %v2412_v16 }
 0x419   :  { %v2421_v44 = vmax.f32 %v2420_v48, 0.0 }
 0x41b   :  { %2422 = vst [vmem:[#allocation5] sm:$0x3] %v2421_v44 }
 0x41c   :  { %3531 = shalt.err (!%p3528_p4)
}
 0x41d   :  { %s3532_s24 = scalar_lea.hbm %s5029_s7, 32 }
 0x41e   :  { %p3533_p5 = scmp.ne.s32.totalorder %s5029_s7, %s3532_s24  ;;  %p3536_p6 = scmp.lt.u32.totalorder %s3532_s24, %s5029_s7 }
 0x420   :  { %p3538_p7 = pnand %p3536_p6, %p3533_p5 }
 0x422   :  { %3541 = shalt.err (!%p3538_p7)
}
 0x423   :  { %2432 = dma.vmem_to_hbm [thread:$0]  %s2430_s20, 32, %s5029_s7, [#allocation6]  }
 0x424   :  { %3542 = dma.done.wait [#allocation6], 32  }
 0x425   :  { %3543 = vsyncadd [#allocation6], 4294967264 }
 0x426   :  { %2436 = vsyncpa [#allocation6], 1 }

</bundles_post_ra>
